<compile_context>
chip_gen: v7x
topology: tpu7x:2x2x1
jax: 0.10.0
libtpu: 0.0.40
codegen_flags: <defaults>
</compile_context>

<pallas_src>
import functools

import jax
import jax.numpy as jnp
from jax import lax
from jax.experimental import pallas as pl
from jax.experimental.pallas import tpu as pltpu

# ----------------------------- problem sizes / opts -----------------------------
B = 8        # batch size
S = 16       # sequence length
H = 64       # encoder hidden size
P = 64       # opt.projection_size
K = 128      # opt.queue_size  (divisible by B, as asserted in the module)
V = 100      # vocab size

TEMPERATURE = 0.05        # opt.temperature
LABEL_SMOOTHING = 0.1     # opt.label_smoothing
MARGIN = 2.0              # margin_ranking_loss margin
ALPHA = 0.8               # loss / logits blending coefficient
NORM_QUERY = True         # opt.norm_query
NORM_DOC = True           # opt.norm_doc
MOMENTUM = 0.999          # opt.momentum (unused: stats_prefix='' -> no k update)


def _vmem_spec():
    return pl.BlockSpec(memory_space=pltpu.MemorySpace.VMEM)


# ------------------------------- fused forward kernel ----------------------------
def _timemoco_kernel(q_tok_ref, q_mask_ref, p_tok_ref, p_mask_ref,
                     wp_tok_ref, wp_mask_ref,
                     emb_q_ref, w_q_ref, b_q_ref,
                     emb_k_ref, w_k_ref, b_k_ref,
                     p_queue_ref, wp_queue_ref,
                     out_ref, *,
                     temperature, label_smoothing, margin, alpha,
                     norm_query, norm_doc):
    f32 = jnp.float32
    vocab = emb_q_ref.shape[0]
    k_sz = p_queue_ref.shape[1]
    bsz = q_tok_ref.shape[0]
    n_cls = k_sz + 1            # classes in logits = [l_pos, l_neg]

    def encode(tokens, mask, emb_table, w, b, normalize):
        # masked mean ("average") pooling + linear projection (+ L2 normalize)
        n, s = tokens.shape
        iota_v = lax.broadcasted_iota(jnp.int32, (n, s, vocab), 2)
        onehot = (iota_v == tokens[:, :, None]).astype(f32)            # (n,S,V)
        w_tok = jnp.sum(onehot * mask[:, :, None], axis=1)             # (n,V) masked token weights
        pooled = jnp.dot(w_tok, emb_table,
                         preferred_element_type=f32)                   # (n,H) masked sum of embeddings
        denom = jnp.sum(mask, axis=1, keepdims=True)                   # (n,1)
        pooled = pooled * pl.reciprocal(jnp.maximum(denom, 1e-9), approx=True)
        proj = jnp.dot(pooled, w, preferred_element_type=f32) + b      # (n,P)
        if normalize:   # torch.nn.functional.normalize(dim=-1), eps=1e-12
            sq = jnp.sum(proj * proj, axis=-1, keepdims=True)
            proj = proj * lax.rsqrt(jnp.maximum(sq, 1e-24))
        return proj

    # encoder_q(q_tokens)
    q = encode(q_tok_ref[...], q_mask_ref[...].astype(f32),
               emb_q_ref[...].astype(f32), w_q_ref[...].astype(f32),
               b_q_ref[...].astype(f32), norm_query)

    # encoder_k(p_tokens) and encoder_k(wp_tokens) share parameters -> one stacked pass
    pw_tok = jnp.concatenate([p_tok_ref[...], wp_tok_ref[...]], axis=0)        # (2B,S)
    pw_mask = jnp.concatenate([p_mask_ref[...], wp_mask_ref[...]],
                              axis=0).astype(f32)                              # (2B,S)
    pw = encode(pw_tok, pw_mask,
                emb_k_ref[...].astype(f32), w_k_ref[...].astype(f32),
                b_k_ref[...].astype(f32), norm_doc)                            # (2B,P)
    p = pw[:bsz]
    wp = pw[bsz:]

    # logits (temperature folded into q once)
    inv_t = 1.0 / temperature
    qs = q * inv_t                                                             # (B,P)
    lpos_p = jnp.sum(qs * p, axis=-1, keepdims=True)                           # (B,1)
    lpos_wp = jnp.sum(qs * wp, axis=-1, keepdims=True)                         # (B,1)
    queues = jnp.concatenate([p_queue_ref[...].astype(f32),
                              wp_queue_ref[...].astype(f32)], axis=1)          # (P,2K)
    lneg = jnp.dot(qs, queues, preferred_element_type=f32)                     # (B,2K)
    lneg_p = lneg[:, :k_sz]
    lneg_wp = lneg[:, k_sz:]

    def ce_and_correct(lpos, lneg_):
        # cross_entropy(logits, labels=0, label_smoothing=ls)
        mneg = jnp.max(lneg_, axis=-1, keepdims=True)
        m = jnp.maximum(lpos, mneg)
        lse = jnp.log(jnp.exp(lpos - m)
                      + jnp.sum(jnp.exp(lneg_ - m), axis=-1, keepdims=True)) + m
        nll0 = lse - lpos                                              # -log p_0
        smooth = n_cls * lse - (lpos + jnp.sum(lneg_, axis=-1, keepdims=True))
        loss_i = (1.0 - label_smoothing) * nll0 + (label_smoothing / n_cls) * smooth
        correct = (lpos >= mneg).astype(f32)   # argmax == 0 (tie -> first index)
        return jnp.mean(loss_i), correct

    p_loss, correct_p = ce_and_correct(lpos_p, lneg_p)
    wp_loss, correct_wp = ce_and_correct(lpos_wp, lneg_wp)

    # margin_ranking_loss(p_logits, wp_logits, target=1, margin=2), rows restricted
    # to the intersection of rows where both predict class 0 (fallback: all rows)
    hinge_pos = jnp.maximum(0.0, margin - (lpos_p - lpos_wp))                  # (B,1)
    hinge_neg = jnp.maximum(0.0, margin - (lneg_p - lneg_wp))                  # (B,K)
    row_hinge = hinge_pos + jnp.sum(hinge_neg, axis=-1, keepdims=True)         # (B,1)
    inter = correct_p * correct_wp                                             # (B,1)
    n_int = jnp.sum(inter)
    rank_masked = jnp.sum(row_hinge * inter) / (jnp.maximum(n_int, 1.0) * n_cls)
    rank_full = jnp.sum(row_hinge) / (bsz * n_cls)
    rank_loss = jnp.where(n_int > 0.0, rank_masked, rank_full)

    loss = alpha * p_loss + (1.0 - alpha) * wp_loss + rank_loss

    # accuracy on blended logits: argmax(alpha*p_logits + (1-alpha)*wp_logits) == 0
    bl_pos = alpha * lpos_p + (1.0 - alpha) * lpos_wp
    bl_neg = alpha * lneg_p + (1.0 - alpha) * lneg_wp
    correct_blend = (bl_pos >= jnp.max(bl_neg, axis=-1, keepdims=True)).astype(f32)
    accuracy = 100.0 * jnp.mean(correct_blend)

    # std stats (torch.std is unbiased -> ddof=1), over already-resident vectors
    def std_mean(x):
        n = x.shape[0]
        mu = jnp.mean(x, axis=0, keepdims=True)
        var = jnp.sum((x - mu) * (x - mu), axis=0, keepdims=True) / (n - 1)
        return jnp.mean(jnp.sqrt(var))

    stdq = std_mean(q)
    stdp = std_mean(p)
    stdwp = std_mean(wp)

    # pack all 8 scalars into one (1, 8) output (single store, single output DMA)
    vals = (loss, p_loss, wp_loss, rank_loss, accuracy, stdq, stdp, stdwp)
    lane = lax.broadcasted_iota(jnp.int32, (1, 8), 1)
    packed = jnp.full((1, 8), vals[0], f32)
    for i in range(1, 8):
        packed = jnp.where(lane == i, vals[i], packed)
    out_ref[...] = packed


def _fused_call(params, q_tokens, q_mask, p_tokens, p_mask, wp_tokens, wp_mask):
    kernel = functools.partial(
        _timemoco_kernel,
        temperature=TEMPERATURE, label_smoothing=LABEL_SMOOTHING,
        margin=MARGIN, alpha=ALPHA,
        norm_query=NORM_QUERY, norm_doc=NORM_DOC)
    return pl.pallas_call(
        kernel,
        out_shape=jax.ShapeDtypeStruct((1, 8), jnp.float32),
        in_specs=[_vmem_spec()] * 14,
        out_specs=_vmem_spec(),
    )(q_tokens.astype(jnp.int32), q_mask.astype(jnp.float32),
      p_tokens.astype(jnp.int32), p_mask.astype(jnp.float32),
      wp_tokens.astype(jnp.int32), wp_mask.astype(jnp.float32),
      params['emb_q'], params['w_q'], params['b_q'],
      params['emb_k'], params['w_k'], params['b_k'],
      params['p_queue'], params['wp_queue'])


# ------------------------------ forward (module glue) ----------------------------
def forward(params, q_tokens, q_mask, k_tokens, k_mask,
            stats_prefix='', iter_stats=None, **kwargs):
    """Mirrors TimeMoCo.forward; k_tokens/k_mask are unused (as in the torch code)."""
    if iter_stats is None:
        iter_stats = {}
    bsz = q_tokens.shape[0]

    # TODO(synk): momentum update of encoder_k and p_queue/wp_queue dequeue+enqueue
    # are stateful training-time ops (stats_prefix=='train') and are not exercised
    # by this eval-style forward pass (stats_prefix='').

    out = _fused_call(params, q_tokens, q_mask,
                      kwargs['p_tokens'], kwargs['p_mask'],
                      kwargs['wp_tokens'], kwargs['wp_mask'])
    loss = out[0, 0]
    p_loss = out[0, 1]
    wp_loss = out[0, 2]
    rank_loss = out[0, 3]
    accuracy = out[0, 4]
    stdq = out[0, 5]
    stdp = out[0, 6]
    stdwp = out[0, 7]

    if len(stats_prefix) > 0:
        stats_prefix = stats_prefix + '/'
    iter_stats[f'{stats_prefix}p_loss'] = (p_loss, bsz)
    iter_stats[f'{stats_prefix}wp_loss'] = (wp_loss, bsz)
    iter_stats[f'{stats_prefix}rank_loss'] = (rank_loss, bsz)
    iter_stats[f'{stats_prefix}all_loss'] = (loss, bsz)
    iter_stats[f'{stats_prefix}accuracy'] = (accuracy, bsz)
    iter_stats[f'{stats_prefix}stdq'] = (stdq, bsz)
    iter_stats[f'{stats_prefix}stdp'] = (stdp, bsz)
    iter_stats[f'{stats_prefix}stdwp'] = (stdwp, bsz)
    return loss, iter_stats


# ---------------------------------- main -----------------------------------------
if __name__ == "__main__":
    key = jax.random.PRNGKey(0)
    ks = jax.random.split(key, 14)

    # encoder_q parameters
    emb_q = jax.random.normal(ks[0], (V, H), jnp.float32) * 0.02
    w_q = jax.random.normal(ks[1], (H, P), jnp.float32) * 0.05
    b_q = jax.random.normal(ks[2], (1, P), jnp.float32) * 0.01
    # encoder_k = deepcopy(encoder_q)
    emb_k, w_k, b_k = emb_q, w_q, b_q

    def make_queue(k):
        qbuf = jax.random.normal(k, (P, K), jnp.float32)
        return qbuf / jnp.maximum(
            jnp.sqrt(jnp.sum(qbuf * qbuf, axis=0, keepdims=True)), 1e-12)

    p_queue = make_queue(ks[3])       # p_queue = normalize(randn(P, K), dim=0)
    wp_queue = make_queue(ks[12])     # wp_queue = normalize(randn(P, K), dim=0)

    params = dict(emb_q=emb_q, w_q=w_q, b_q=b_q,
                  emb_k=emb_k, w_k=w_k, b_k=b_k,
                  p_queue=p_queue, wp_queue=wp_queue)

    def make_tokens_mask(k1, k2):
        toks = jax.random.randint(k1, (B, S), 0, V, dtype=jnp.int32)
        lens = jax.random.randint(k2, (B,), 4, S + 1)
        mask = (jnp.arange(S)[None, :] < lens[:, None]).astype(jnp.float32)
        return toks, mask

    q_tokens, q_mask = make_tokens_mask(ks[4], ks[5])
    k_tokens, k_mask = make_tokens_mask(ks[6], ks[7])
    p_tokens, p_mask = make_tokens_mask(ks[8], ks[9])
    wp_tokens, wp_mask = make_tokens_mask(ks[10], ks[11])

    loss, iter_stats = forward(params, q_tokens, q_mask, k_tokens, k_mask,
                               stats_prefix='',
                               p_tokens=p_tokens, p_mask=p_mask,
                               wp_tokens=wp_tokens, wp_mask=wp_mask)
    loss = jax.block_until_ready(loss)
    for v, _ in iter_stats.values():
        jax.block_until_ready(v)
    print("KERNEL_OK")
</pallas_src>

<mosaic_0001>
module attributes {stable_mosaic.version = 11 : i64} {
  func.func @_timemoco_kernel(%arg0: memref<8x16xi32, #tpu.memory_space<vmem>>, %arg1: memref<8x16xf32, #tpu.memory_space<vmem>>, %arg2: memref<8x16xi32, #tpu.memory_space<vmem>>, %arg3: memref<8x16xf32, #tpu.memory_space<vmem>>, %arg4: memref<8x16xi32, #tpu.memory_space<vmem>>, %arg5: memref<8x16xf32, #tpu.memory_space<vmem>>, %arg6: memref<100x64xf32, #tpu.memory_space<vmem>>, %arg7: memref<64x64xf32, #tpu.memory_space<vmem>>, %arg8: memref<1x64xf32, #tpu.memory_space<vmem>>, %arg9: memref<100x64xf32, #tpu.memory_space<vmem>>, %arg10: memref<64x64xf32, #tpu.memory_space<vmem>>, %arg11: memref<1x64xf32, #tpu.memory_space<vmem>>, %arg12: memref<64x128xf32, #tpu.memory_space<vmem>>, %arg13: memref<64x128xf32, #tpu.memory_space<vmem>>, %arg14: memref<1x8xf32, #tpu.memory_space<vmem>>) attributes {dimension_semantics = [], scalar_prefetch = 0 : i64, scratch_operands = 0 : i64, tpu.core_type = #tpu.core_type<tc>} {
    %c0 = arith.constant 0 : index
    %c0_0 = arith.constant 0 : index
    %0 = vector.load %arg0[%c0, %c0_0] : memref<8x16xi32, #tpu.memory_space<vmem>>, vector<8x16xi32>
    %c0_1 = arith.constant 0 : index
    %c0_2 = arith.constant 0 : index
    %1 = vector.load %arg1[%c0_1, %c0_2] : memref<8x16xf32, #tpu.memory_space<vmem>>, vector<8x16xf32>
    %c0_3 = arith.constant 0 : index
    %c0_4 = arith.constant 0 : index
    %2 = vector.load %arg6[%c0_3, %c0_4] : memref<100x64xf32, #tpu.memory_space<vmem>>, vector<100x64xf32>
    %c0_5 = arith.constant 0 : index
    %c0_6 = arith.constant 0 : index
    %3 = vector.load %arg7[%c0_5, %c0_6] : memref<64x64xf32, #tpu.memory_space<vmem>>, vector<64x64xf32>
    %c0_7 = arith.constant 0 : index
    %c0_8 = arith.constant 0 : index
    %4 = vector.load %arg8[%c0_7, %c0_8] : memref<1x64xf32, #tpu.memory_space<vmem>>, vector<1x64xf32>
    %5 = tpu.iota {dimensions = array<i32: 2>} : vector<8x16x100xi32>
    %6 = vector.shape_cast %0 : vector<8x16xi32> to vector<8x16x1xi32>
    %7 = vector.broadcast %6 : vector<8x16x1xi32> to vector<8x16x100xi32>
    %8 = arith.cmpi eq, %5, %7 : vector<8x16x100xi32>
    %9 = arith.extui %8 : vector<8x16x100xi1> to vector<8x16x100xi32>
    %10 = arith.sitofp %9 : vector<8x16x100xi32> to vector<8x16x100xf32>
    %11 = vector.shape_cast %1 : vector<8x16xf32> to vector<8x16x1xf32>
    %12 = vector.broadcast %11 : vector<8x16x1xf32> to vector<8x16x100xf32>
    %13 = arith.mulf %10, %12 : vector<8x16x100xf32>
    %cst = arith.constant dense<0.000000e+00> : vector<8x100xf32>
    %14 = vector.multi_reduction <add>, %13, %cst [1] : vector<8x16x100xf32> to vector<8x100xf32>
    %cst_9 = arith.constant dense<0.000000e+00> : vector<8x64xf32>
    %15 = tpu.matmul %14, %2, %cst_9 {dimension_numbers = #tpu.dot_dimension_numbers<[1], [0], [0], [1], [0, 0, 1, 1], [], []>} : vector<8x100xf32>, vector<100x64xf32>, vector<8x64xf32> -> vector<8x64xf32>
    %cst_10 = arith.constant dense<0.000000e+00> : vector<8xf32>
    %16 = vector.multi_reduction <add>, %1, %cst_10 [1] : vector<8x16xf32> to vector<8xf32>
    %17 = vector.shape_cast %16 : vector<8xf32> to vector<8x1xf32>
    %cst_11 = arith.constant 9.99999971E-10 : f32
    %18 = vector.broadcast %cst_11 : f32 to vector<8x1xf32>
    %19 = arith.maximumf %17, %18 : vector<8x1xf32>
    %20 = tpu.reciprocal %19 {approx = true} : vector<8x1xf32> -> vector<8x1xf32>
    %21 = vector.broadcast %20 : vector<8x1xf32> to vector<8x64xf32>
    %22 = arith.mulf %15, %21 : vector<8x64xf32>
    %cst_12 = arith.constant dense<0.000000e+00> : vector<8x64xf32>
    %23 = tpu.matmul %22, %3, %cst_12 {dimension_numbers = #tpu.dot_dimension_numbers<[1], [0], [0], [1], [0, 0, 1, 1], [], []>} : vector<8x64xf32>, vector<64x64xf32>, vector<8x64xf32> -> vector<8x64xf32>
    %24 = vector.broadcast %4 : vector<1x64xf32> to vector<8x64xf32>
    %25 = arith.addf %23, %24 : vector<8x64xf32>
    %26 = arith.mulf %25, %25 : vector<8x64xf32>
    %cst_13 = arith.constant dense<0.000000e+00> : vector<8xf32>
    %27 = vector.multi_reduction <add>, %26, %cst_13 [1] : vector<8x64xf32> to vector<8xf32>
    %28 = vector.shape_cast %27 : vector<8xf32> to vector<8x1xf32>
    %cst_14 = arith.constant 1.000000e-24 : f32
    %29 = vector.broadcast %cst_14 : f32 to vector<8x1xf32>
    %30 = arith.maximumf %28, %29 : vector<8x1xf32>
    %31 = math.rsqrt %30 : vector<8x1xf32>
    %32 = vector.broadcast %31 : vector<8x1xf32> to vector<8x64xf32>
    %33 = arith.mulf %25, %32 : vector<8x64xf32>
    %c0_15 = arith.constant 0 : index
    %c0_16 = arith.constant 0 : index
    %34 = vector.load %arg2[%c0_15, %c0_16] : memref<8x16xi32, #tpu.memory_space<vmem>>, vector<8x16xi32>
    %c0_17 = arith.constant 0 : index
    %c0_18 = arith.constant 0 : index
    %35 = vector.load %arg4[%c0_17, %c0_18] : memref<8x16xi32, #tpu.memory_space<vmem>>, vector<8x16xi32>
    %36 = tpu.concatenate %34, %35 in 0 : vector<8x16xi32>, vector<8x16xi32> -> vector<16x16xi32>
    %c0_19 = arith.constant 0 : index
    %c0_20 = arith.constant 0 : index
    %37 = vector.load %arg3[%c0_19, %c0_20] : memref<8x16xf32, #tpu.memory_space<vmem>>, vector<8x16xf32>
    %c0_21 = arith.constant 0 : index
    %c0_22 = arith.constant 0 : index
    %38 = vector.load %arg5[%c0_21, %c0_22] : memref<8x16xf32, #tpu.memory_space<vmem>>, vector<8x16xf32>
    %39 = tpu.concatenate %37, %38 in 0 : vector<8x16xf32>, vector<8x16xf32> -> vector<16x16xf32>
    %c0_23 = arith.constant 0 : index
    %c0_24 = arith.constant 0 : index
    %40 = vector.load %arg9[%c0_23, %c0_24] : memref<100x64xf32, #tpu.memory_space<vmem>>, vector<100x64xf32>
    %c0_25 = arith.constant 0 : index
    %c0_26 = arith.constant 0 : index
    %41 = vector.load %arg10[%c0_25, %c0_26] : memref<64x64xf32, #tpu.memory_space<vmem>>, vector<64x64xf32>
    %c0_27 = arith.constant 0 : index
    %c0_28 = arith.constant 0 : index
    %42 = vector.load %arg11[%c0_27, %c0_28] : memref<1x64xf32, #tpu.memory_space<vmem>>, vector<1x64xf32>
    %43 = tpu.iota {dimensions = array<i32: 2>} : vector<16x16x100xi32>
    %44 = vector.shape_cast %36 : vector<16x16xi32> to vector<16x16x1xi32>
    %45 = vector.broadcast %44 : vector<16x16x1xi32> to vector<16x16x100xi32>
    %46 = arith.cmpi eq, %43, %45 : vector<16x16x100xi32>
    %47 = arith.extui %46 : vector<16x16x100xi1> to vector<16x16x100xi32>
    %48 = arith.sitofp %47 : vector<16x16x100xi32> to vector<16x16x100xf32>
    %49 = vector.shape_cast %39 : vector<16x16xf32> to vector<16x16x1xf32>
    %50 = vector.broadcast %49 : vector<16x16x1xf32> to vector<16x16x100xf32>
    %51 = arith.mulf %48, %50 : vector<16x16x100xf32>
    %cst_29 = arith.constant dense<0.000000e+00> : vector<16x100xf32>
    %52 = vector.multi_reduction <add>, %51, %cst_29 [1] : vector<16x16x100xf32> to vector<16x100xf32>
    %cst_30 = arith.constant dense<0.000000e+00> : vector<16x64xf32>
    %53 = tpu.matmul %52, %40, %cst_30 {dimension_numbers = #tpu.dot_dimension_numbers<[1], [0], [0], [1], [0, 0, 1, 1], [], []>} : vector<16x100xf32>, vector<100x64xf32>, vector<16x64xf32> -> vector<16x64xf32>
    %cst_31 = arith.constant dense<0.000000e+00> : vector<16xf32>
    %54 = vector.multi_reduction <add>, %39, %cst_31 [1] : vector<16x16xf32> to vector<16xf32>
    %55 = vector.shape_cast %54 : vector<16xf32> to vector<16x1xf32>
    %cst_32 = arith.constant 9.99999971E-10 : f32
    %56 = vector.broadcast %cst_32 : f32 to vector<16x1xf32>
    %57 = arith.maximumf %55, %56 : vector<16x1xf32>
    %58 = tpu.reciprocal %57 {approx = true} : vector<16x1xf32> -> vector<16x1xf32>
    %59 = vector.broadcast %58 : vector<16x1xf32> to vector<16x64xf32>
    %60 = arith.mulf %53, %59 : vector<16x64xf32>
    %cst_33 = arith.constant dense<0.000000e+00> : vector<16x64xf32>
    %61 = tpu.matmul %60, %41, %cst_33 {dimension_numbers = #tpu.dot_dimension_numbers<[1], [0], [0], [1], [0, 0, 1, 1], [], []>} : vector<16x64xf32>, vector<64x64xf32>, vector<16x64xf32> -> vector<16x64xf32>
    %62 = vector.broadcast %42 : vector<1x64xf32> to vector<16x64xf32>
    %63 = arith.addf %61, %62 : vector<16x64xf32>
    %64 = arith.mulf %63, %63 : vector<16x64xf32>
    %cst_34 = arith.constant dense<0.000000e+00> : vector<16xf32>
    %65 = vector.multi_reduction <add>, %64, %cst_34 [1] : vector<16x64xf32> to vector<16xf32>
    %66 = vector.shape_cast %65 : vector<16xf32> to vector<16x1xf32>
    %cst_35 = arith.constant 1.000000e-24 : f32
    %67 = vector.broadcast %cst_35 : f32 to vector<16x1xf32>
    %68 = arith.maximumf %66, %67 : vector<16x1xf32>
    %69 = math.rsqrt %68 : vector<16x1xf32>
    %70 = vector.broadcast %69 : vector<16x1xf32> to vector<16x64xf32>
    %71 = arith.mulf %63, %70 : vector<16x64xf32>
    %72 = vector.extract_strided_slice %71 {offsets = [0, 0], sizes = [8, 64], strides = [1, 1]} : vector<16x64xf32> to vector<8x64xf32>
    %73 = vector.extract_strided_slice %71 {offsets = [8, 0], sizes = [8, 64], strides = [1, 1]} : vector<16x64xf32> to vector<8x64xf32>
    %cst_36 = arith.constant 2.000000e+01 : f32
    %74 = vector.broadcast %cst_36 : f32 to vector<8x64xf32>
    %75 = arith.mulf %33, %74 : vector<8x64xf32>
    %76 = arith.mulf %75, %72 : vector<8x64xf32>
    %cst_37 = arith.constant dense<0.000000e+00> : vector<8xf32>
    %77 = vector.multi_reduction <add>, %76, %cst_37 [1] : vector<8x64xf32> to vector<8xf32>
    %78 = vector.shape_cast %77 : vector<8xf32> to vector<8x1xf32>
    %79 = arith.mulf %75, %73 : vector<8x64xf32>
    %cst_38 = arith.constant dense<0.000000e+00> : vector<8xf32>
    %80 = vector.multi_reduction <add>, %79, %cst_38 [1] : vector<8x64xf32> to vector<8xf32>
    %81 = vector.shape_cast %80 : vector<8xf32> to vector<8x1xf32>
    %c0_39 = arith.constant 0 : index
    %c0_40 = arith.constant 0 : index
    %82 = vector.load %arg12[%c0_39, %c0_40] : memref<64x128xf32, #tpu.memory_space<vmem>>, vector<64x128xf32>
    %c0_41 = arith.constant 0 : index
    %c0_42 = arith.constant 0 : index
    %83 = vector.load %arg13[%c0_41, %c0_42] : memref<64x128xf32, #tpu.memory_space<vmem>>, vector<64x128xf32>
    %84 = tpu.concatenate %82, %83 in 1 : vector<64x128xf32>, vector<64x128xf32> -> vector<64x256xf32>
    %cst_43 = arith.constant dense<0.000000e+00> : vector<8x256xf32>
    %85 = tpu.matmul %75, %84, %cst_43 {dimension_numbers = #tpu.dot_dimension_numbers<[1], [0], [0], [1], [0, 0, 1, 1], [], []>} : vector<8x64xf32>, vector<64x256xf32>, vector<8x256xf32> -> vector<8x256xf32>
    %86 = vector.extract_strided_slice %85 {offsets = [0, 0], sizes = [8, 128], strides = [1, 1]} : vector<8x256xf32> to vector<8x128xf32>
    %87 = vector.extract_strided_slice %85 {offsets = [0, 128], sizes = [8, 128], strides = [1, 1]} : vector<8x256xf32> to vector<8x128xf32>
    %cst_44 = arith.constant dense<0xFF800000> : vector<8xf32>
    %88 = vector.multi_reduction <maximumf>, %86, %cst_44 [1] : vector<8x128xf32> to vector<8xf32>
    %89 = vector.shape_cast %88 : vector<8xf32> to vector<8x1xf32>
    %90 = arith.maximumf %78, %89 : vector<8x1xf32>
    %91 = arith.subf %78, %90 : vector<8x1xf32>
    %92 = math.exp %91 : vector<8x1xf32>
    %93 = vector.broadcast %90 : vector<8x1xf32> to vector<8x128xf32>
    %94 = arith.subf %86, %93 : vector<8x128xf32>
    %95 = math.exp %94 : vector<8x128xf32>
    %cst_45 = arith.constant dense<0.000000e+00> : vector<8xf32>
    %96 = vector.multi_reduction <add>, %95, %cst_45 [1] : vector<8x128xf32> to vector<8xf32>
    %97 = vector.shape_cast %96 : vector<8xf32> to vector<8x1xf32>
    %98 = arith.addf %92, %97 : vector<8x1xf32>
    %99 = math.log %98 : vector<8x1xf32>
    %100 = arith.addf %99, %90 : vector<8x1xf32>
    %101 = arith.subf %100, %78 : vector<8x1xf32>
    %cst_46 = arith.constant 1.290000e+02 : f32
    %102 = vector.broadcast %cst_46 : f32 to vector<8x1xf32>
    %103 = arith.mulf %102, %100 : vector<8x1xf32>
    %cst_47 = arith.constant dense<0.000000e+00> : vector<8xf32>
    %104 = vector.multi_reduction <add>, %86, %cst_47 [1] : vector<8x128xf32> to vector<8xf32>
    %105 = vector.shape_cast %104 : vector<8xf32> to vector<8x1xf32>
    %106 = arith.addf %78, %105 : vector<8x1xf32>
    %107 = arith.subf %103, %106 : vector<8x1xf32>
    %cst_48 = arith.constant 0.899999976 : f32
    %108 = vector.broadcast %cst_48 : f32 to vector<8x1xf32>
    %109 = arith.mulf %108, %101 : vector<8x1xf32>
    %cst_49 = arith.constant 7.75193795E-4 : f32
    %110 = vector.broadcast %cst_49 : f32 to vector<8x1xf32>
    %111 = arith.mulf %110, %107 : vector<8x1xf32>
    %112 = arith.addf %109, %111 : vector<8x1xf32>
    %113 = arith.cmpf oge, %78, %89 : vector<8x1xf32>
    %114 = arith.extui %113 : vector<8x1xi1> to vector<8x1xi32>
    %115 = arith.sitofp %114 : vector<8x1xi32> to vector<8x1xf32>
    %116 = vector.shape_cast %112 : vector<8x1xf32> to vector<1x8x1xf32>
    %cst_50 = arith.constant dense<0.000000e+00> : vector<1xf32>
    %117 = vector.multi_reduction <add>, %116, %cst_50 [1, 2] : vector<1x8x1xf32> to vector<1xf32>
    %118 = vector.shape_cast %117 : vector<1xf32> to vector<1x1x1xf32>
    %119 = vector.extract %118[0, 0, 0] : f32 from vector<1x1x1xf32>
    %cst_51 = arith.constant 8.000000e+00 : f32
    %120 = arith.divf %119, %cst_51 : f32
    %cst_52 = arith.constant dense<0xFF800000> : vector<8xf32>
    %121 = vector.multi_reduction <maximumf>, %87, %cst_52 [1] : vector<8x128xf32> to vector<8xf32>
    %122 = vector.shape_cast %121 : vector<8xf32> to vector<8x1xf32>
    %123 = arith.maximumf %81, %122 : vector<8x1xf32>
    %124 = arith.subf %81, %123 : vector<8x1xf32>
    %125 = math.exp %124 : vector<8x1xf32>
    %126 = vector.broadcast %123 : vector<8x1xf32> to vector<8x128xf32>
    %127 = arith.subf %87, %126 : vector<8x128xf32>
    %128 = math.exp %127 : vector<8x128xf32>
    %cst_53 = arith.constant dense<0.000000e+00> : vector<8xf32>
    %129 = vector.multi_reduction <add>, %128, %cst_53 [1] : vector<8x128xf32> to vector<8xf32>
    %130 = vector.shape_cast %129 : vector<8xf32> to vector<8x1xf32>
    %131 = arith.addf %125, %130 : vector<8x1xf32>
    %132 = math.log %131 : vector<8x1xf32>
    %133 = arith.addf %132, %123 : vector<8x1xf32>
    %134 = arith.subf %133, %81 : vector<8x1xf32>
    %cst_54 = arith.constant 1.290000e+02 : f32
    %135 = vector.broadcast %cst_54 : f32 to vector<8x1xf32>
    %136 = arith.mulf %135, %133 : vector<8x1xf32>
    %cst_55 = arith.constant dense<0.000000e+00> : vector<8xf32>
    %137 = vector.multi_reduction <add>, %87, %cst_55 [1] : vector<8x128xf32> to vector<8xf32>
    %138 = vector.shape_cast %137 : vector<8xf32> to vector<8x1xf32>
    %139 = arith.addf %81, %138 : vector<8x1xf32>
    %140 = arith.subf %136, %139 : vector<8x1xf32>
    %cst_56 = arith.constant 0.899999976 : f32
    %141 = vector.broadcast %cst_56 : f32 to vector<8x1xf32>
    %142 = arith.mulf %141, %134 : vector<8x1xf32>
    %cst_57 = arith.constant 7.75193795E-4 : f32
    %143 = vector.broadcast %cst_57 : f32 to vector<8x1xf32>
    %144 = arith.mulf %143, %140 : vector<8x1xf32>
    %145 = arith.addf %142, %144 : vector<8x1xf32>
    %146 = arith.cmpf oge, %81, %122 : vector<8x1xf32>
    %147 = arith.extui %146 : vector<8x1xi1> to vector<8x1xi32>
    %148 = arith.sitofp %147 : vector<8x1xi32> to vector<8x1xf32>
    %149 = vector.shape_cast %145 : vector<8x1xf32> to vector<1x8x1xf32>
    %cst_58 = arith.constant dense<0.000000e+00> : vector<1xf32>
    %150 = vector.multi_reduction <add>, %149, %cst_58 [1, 2] : vector<1x8x1xf32> to vector<1xf32>
    %151 = vector.shape_cast %150 : vector<1xf32> to vector<1x1x1xf32>
    %152 = vector.extract %151[0, 0, 0] : f32 from vector<1x1x1xf32>
    %cst_59 = arith.constant 8.000000e+00 : f32
    %153 = arith.divf %152, %cst_59 : f32
    %154 = arith.subf %78, %81 : vector<8x1xf32>
    %cst_60 = arith.constant 2.000000e+00 : f32
    %155 = vector.broadcast %cst_60 : f32 to vector<8x1xf32>
    %156 = arith.subf %155, %154 : vector<8x1xf32>
    %cst_61 = arith.constant 0.000000e+00 : f32
    %157 = vector.broadcast %cst_61 : f32 to vector<8x1xf32>
    %158 = arith.maximumf %157, %156 : vector<8x1xf32>
    %159 = arith.subf %86, %87 : vector<8x128xf32>
    %cst_62 = arith.constant 2.000000e+00 : f32
    %160 = vector.broadcast %cst_62 : f32 to vector<8x128xf32>
    %161 = arith.subf %160, %159 : vector<8x128xf32>
    %cst_63 = arith.constant 0.000000e+00 : f32
    %162 = vector.broadcast %cst_63 : f32 to vector<8x128xf32>
    %163 = arith.maximumf %162, %161 : vector<8x128xf32>
    %cst_64 = arith.constant dense<0.000000e+00> : vector<8xf32>
    %164 = vector.multi_reduction <add>, %163, %cst_64 [1] : vector<8x128xf32> to vector<8xf32>
    %165 = vector.shape_cast %164 : vector<8xf32> to vector<8x1xf32>
    %166 = arith.addf %158, %165 : vector<8x1xf32>
    %167 = arith.mulf %115, %148 : vector<8x1xf32>
    %168 = vector.shape_cast %167 : vector<8x1xf32> to vector<1x8x1xf32>
    %cst_65 = arith.constant dense<0.000000e+00> : vector<1xf32>
    %169 = vector.multi_reduction <add>, %168, %cst_65 [1, 2] : vector<1x8x1xf32> to vector<1xf32>
    %170 = vector.shape_cast %169 : vector<1xf32> to vector<1x1x1xf32>
    %171 = vector.extract %170[0, 0, 0] : f32 from vector<1x1x1xf32>
    %172 = arith.mulf %166, %167 : vector<8x1xf32>
    %173 = vector.shape_cast %172 : vector<8x1xf32> to vector<1x8x1xf32>
    %cst_66 = arith.constant dense<0.000000e+00> : vector<1xf32>
    %174 = vector.multi_reduction <add>, %173, %cst_66 [1, 2] : vector<1x8x1xf32> to vector<1xf32>
    %175 = vector.shape_cast %174 : vector<1xf32> to vector<1x1x1xf32>
    %176 = vector.extract %175[0, 0, 0] : f32 from vector<1x1x1xf32>
    %cst_67 = arith.constant 1.000000e+00 : f32
    %177 = arith.maximumf %171, %cst_67 : f32
    %cst_68 = arith.constant 1.290000e+02 : f32
    %178 = arith.mulf %177, %cst_68 : f32
    %179 = arith.divf %176, %178 : f32
    %180 = vector.shape_cast %166 : vector<8x1xf32> to vector<1x8x1xf32>
    %cst_69 = arith.constant dense<0.000000e+00> : vector<1xf32>
    %181 = vector.multi_reduction <add>, %180, %cst_69 [1, 2] : vector<1x8x1xf32> to vector<1xf32>
    %182 = vector.shape_cast %181 : vector<1xf32> to vector<1x1x1xf32>
    %183 = vector.extract %182[0, 0, 0] : f32 from vector<1x1x1xf32>
    %cst_70 = arith.constant 1.032000e+03 : f32
    %184 = arith.divf %183, %cst_70 : f32
    %cst_71 = arith.constant 0.000000e+00 : f32
    %185 = arith.cmpf ogt, %171, %cst_71 : f32
    %186 = arith.select %185, %179, %184 : f32
    %cst_72 = arith.constant 8.000000e-01 : f32
    %187 = arith.mulf %cst_72, %120 : f32
    %cst_73 = arith.constant 2.000000e-01 : f32
    %188 = arith.mulf %cst_73, %153 : f32
    %189 = arith.addf %187, %188 : f32
    %190 = arith.addf %189, %186 : f32
    %cst_74 = arith.constant 8.000000e-01 : f32
    %191 = vector.broadcast %cst_74 : f32 to vector<8x1xf32>
    %192 = arith.mulf %191, %78 : vector<8x1xf32>
    %cst_75 = arith.constant 2.000000e-01 : f32
    %193 = vector.broadcast %cst_75 : f32 to vector<8x1xf32>
    %194 = arith.mulf %193, %81 : vector<8x1xf32>
    %195 = arith.addf %192, %194 : vector<8x1xf32>
    %cst_76 = arith.constant 8.000000e-01 : f32
    %196 = vector.broadcast %cst_76 : f32 to vector<8x128xf32>
    %197 = arith.mulf %196, %86 : vector<8x128xf32>
    %cst_77 = arith.constant 2.000000e-01 : f32
    %198 = vector.broadcast %cst_77 : f32 to vector<8x128xf32>
    %199 = arith.mulf %198, %87 : vector<8x128xf32>
    %200 = arith.addf %197, %199 : vector<8x128xf32>
    %cst_78 = arith.constant dense<0xFF800000> : vector<8xf32>
    %201 = vector.multi_reduction <maximumf>, %200, %cst_78 [1] : vector<8x128xf32> to vector<8xf32>
    %202 = vector.shape_cast %201 : vector<8xf32> to vector<8x1xf32>
    %203 = arith.cmpf oge, %195, %202 : vector<8x1xf32>
    %204 = arith.extui %203 : vector<8x1xi1> to vector<8x1xi32>
    %205 = arith.sitofp %204 : vector<8x1xi32> to vector<8x1xf32>
    %206 = vector.shape_cast %205 : vector<8x1xf32> to vector<1x8x1xf32>
    %cst_79 = arith.constant dense<0.000000e+00> : vector<1xf32>
    %207 = vector.multi_reduction <add>, %206, %cst_79 [1, 2] : vector<1x8x1xf32> to vector<1xf32>
    %208 = vector.shape_cast %207 : vector<1xf32> to vector<1x1x1xf32>
    %209 = vector.extract %208[0, 0, 0] : f32 from vector<1x1x1xf32>
    %cst_80 = arith.constant 8.000000e+00 : f32
    %210 = arith.divf %209, %cst_80 : f32
    %cst_81 = arith.constant 1.000000e+02 : f32
    %211 = arith.mulf %cst_81, %210 : f32
    %cst_82 = arith.constant dense<0.000000e+00> : vector<64xf32>
    %212 = vector.multi_reduction <add>, %33, %cst_82 [0] : vector<8x64xf32> to vector<64xf32>
    %213 = vector.shape_cast %212 : vector<64xf32> to vector<1x64xf32>
    %cst_83 = arith.constant 8.000000e+00 : f32
    %214 = vector.broadcast %cst_83 : f32 to vector<1x64xf32>
    %215 = arith.divf %213, %214 : vector<1x64xf32>
    %216 = vector.broadcast %215 : vector<1x64xf32> to vector<8x64xf32>
    %217 = arith.subf %33, %216 : vector<8x64xf32>
    %218 = vector.broadcast %215 : vector<1x64xf32> to vector<8x64xf32>
    %219 = arith.subf %33, %218 : vector<8x64xf32>
    %220 = arith.mulf %217, %219 : vector<8x64xf32>
    %cst_84 = arith.constant dense<0.000000e+00> : vector<64xf32>
    %221 = vector.multi_reduction <add>, %220, %cst_84 [0] : vector<8x64xf32> to vector<64xf32>
    %222 = vector.shape_cast %221 : vector<64xf32> to vector<1x64xf32>
    %cst_85 = arith.constant 7.000000e+00 : f32
    %223 = vector.broadcast %cst_85 : f32 to vector<1x64xf32>
    %224 = arith.divf %222, %223 : vector<1x64xf32>
    %225 = math.sqrt %224 : vector<1x64xf32>
    %226 = vector.shape_cast %225 : vector<1x64xf32> to vector<1x1x64xf32>
    %cst_86 = arith.constant dense<0.000000e+00> : vector<1xf32>
    %227 = vector.multi_reduction <add>, %226, %cst_86 [1, 2] : vector<1x1x64xf32> to vector<1xf32>
    %228 = vector.shape_cast %227 : vector<1xf32> to vector<1x1x1xf32>
    %229 = vector.extract %228[0, 0, 0] : f32 from vector<1x1x1xf32>
    %cst_87 = arith.constant 6.400000e+01 : f32
    %230 = arith.divf %229, %cst_87 : f32
    %cst_88 = arith.constant dense<0.000000e+00> : vector<64xf32>
    %231 = vector.multi_reduction <add>, %72, %cst_88 [0] : vector<8x64xf32> to vector<64xf32>
    %232 = vector.shape_cast %231 : vector<64xf32> to vector<1x64xf32>
    %cst_89 = arith.constant 8.000000e+00 : f32
    %233 = vector.broadcast %cst_89 : f32 to vector<1x64xf32>
    %234 = arith.divf %232, %233 : vector<1x64xf32>
    %235 = vector.broadcast %234 : vector<1x64xf32> to vector<8x64xf32>
    %236 = arith.subf %72, %235 : vector<8x64xf32>
    %237 = vector.broadcast %234 : vector<1x64xf32> to vector<8x64xf32>
    %238 = arith.subf %72, %237 : vector<8x64xf32>
    %239 = arith.mulf %236, %238 : vector<8x64xf32>
    %cst_90 = arith.constant dense<0.000000e+00> : vector<64xf32>
    %240 = vector.multi_reduction <add>, %239, %cst_90 [0] : vector<8x64xf32> to vector<64xf32>
    %241 = vector.shape_cast %240 : vector<64xf32> to vector<1x64xf32>
    %cst_91 = arith.constant 7.000000e+00 : f32
    %242 = vector.broadcast %cst_91 : f32 to vector<1x64xf32>
    %243 = arith.divf %241, %242 : vector<1x64xf32>
    %244 = math.sqrt %243 : vector<1x64xf32>
    %245 = vector.shape_cast %244 : vector<1x64xf32> to vector<1x1x64xf32>
    %cst_92 = arith.constant dense<0.000000e+00> : vector<1xf32>
    %246 = vector.multi_reduction <add>, %245, %cst_92 [1, 2] : vector<1x1x64xf32> to vector<1xf32>
    %247 = vector.shape_cast %246 : vector<1xf32> to vector<1x1x1xf32>
    %248 = vector.extract %247[0, 0, 0] : f32 from vector<1x1x1xf32>
    %cst_93 = arith.constant 6.400000e+01 : f32
    %249 = arith.divf %248, %cst_93 : f32
    %cst_94 = arith.constant dense<0.000000e+00> : vector<64xf32>
    %250 = vector.multi_reduction <add>, %73, %cst_94 [0] : vector<8x64xf32> to vector<64xf32>
    %251 = vector.shape_cast %250 : vector<64xf32> to vector<1x64xf32>
    %cst_95 = arith.constant 8.000000e+00 : f32
    %252 = vector.broadcast %cst_95 : f32 to vector<1x64xf32>
    %253 = arith.divf %251, %252 : vector<1x64xf32>
    %254 = vector.broadcast %253 : vector<1x64xf32> to vector<8x64xf32>
    %255 = arith.subf %73, %254 : vector<8x64xf32>
    %256 = vector.broadcast %253 : vector<1x64xf32> to vector<8x64xf32>
    %257 = arith.subf %73, %256 : vector<8x64xf32>
    %258 = arith.mulf %255, %257 : vector<8x64xf32>
    %cst_96 = arith.constant dense<0.000000e+00> : vector<64xf32>
    %259 = vector.multi_reduction <add>, %258, %cst_96 [0] : vector<8x64xf32> to vector<64xf32>
    %260 = vector.shape_cast %259 : vector<64xf32> to vector<1x64xf32>
    %cst_97 = arith.constant 7.000000e+00 : f32
    %261 = vector.broadcast %cst_97 : f32 to vector<1x64xf32>
    %262 = arith.divf %260, %261 : vector<1x64xf32>
    %263 = math.sqrt %262 : vector<1x64xf32>
    %264 = vector.shape_cast %263 : vector<1x64xf32> to vector<1x1x64xf32>
    %cst_98 = arith.constant dense<0.000000e+00> : vector<1xf32>
    %265 = vector.multi_reduction <add>, %264, %cst_98 [1, 2] : vector<1x1x64xf32> to vector<1xf32>
    %266 = vector.shape_cast %265 : vector<1xf32> to vector<1x1x1xf32>
    %267 = vector.extract %266[0, 0, 0] : f32 from vector<1x1x1xf32>
    %cst_99 = arith.constant 6.400000e+01 : f32
    %268 = arith.divf %267, %cst_99 : f32
    %269 = tpu.iota {dimensions = array<i32: 1>} : vector<1x8xi32>
    %270 = vector.broadcast %190 : f32 to vector<1x8xf32>
    %c1_i32 = arith.constant 1 : i32
    %271 = vector.broadcast %c1_i32 : i32 to vector<1x8xi32>
    %272 = arith.cmpi eq, %269, %271 : vector<1x8xi32>
    %273 = vector.broadcast %120 : f32 to vector<1x8xf32>
    %274 = arith.select %272, %273, %270 : vector<1x8xi1>, vector<1x8xf32>
    %c2_i32 = arith.constant 2 : i32
    %275 = vector.broadcast %c2_i32 : i32 to vector<1x8xi32>
    %276 = arith.cmpi eq, %269, %275 : vector<1x8xi32>
    %277 = vector.broadcast %153 : f32 to vector<1x8xf32>
    %278 = arith.select %276, %277, %274 : vector<1x8xi1>, vector<1x8xf32>
    %c3_i32 = arith.constant 3 : i32
    %279 = vector.broadcast %c3_i32 : i32 to vector<1x8xi32>
    %280 = arith.cmpi eq, %269, %279 : vector<1x8xi32>
    %281 = vector.broadcast %186 : f32 to vector<1x8xf32>
    %282 = arith.select %280, %281, %278 : vector<1x8xi1>, vector<1x8xf32>
    %c4_i32 = arith.constant 4 : i32
    %283 = vector.broadcast %c4_i32 : i32 to vector<1x8xi32>
    %284 = arith.cmpi eq, %269, %283 : vector<1x8xi32>
    %285 = vector.broadcast %211 : f32 to vector<1x8xf32>
    %286 = arith.select %284, %285, %282 : vector<1x8xi1>, vector<1x8xf32>
    %c5_i32 = arith.constant 5 : i32
    %287 = vector.broadcast %c5_i32 : i32 to vector<1x8xi32>
    %288 = arith.cmpi eq, %269, %287 : vector<1x8xi32>
    %289 = vector.broadcast %230 : f32 to vector<1x8xf32>
    %290 = arith.select %288, %289, %286 : vector<1x8xi1>, vector<1x8xf32>
    %c6_i32 = arith.constant 6 : i32
    %291 = vector.broadcast %c6_i32 : i32 to vector<1x8xi32>
    %292 = arith.cmpi eq, %269, %291 : vector<1x8xi32>
    %293 = vector.broadcast %249 : f32 to vector<1x8xf32>
    %294 = arith.select %292, %293, %290 : vector<1x8xi1>, vector<1x8xf32>
    %c7_i32 = arith.constant 7 : i32
    %295 = vector.broadcast %c7_i32 : i32 to vector<1x8xi32>
    %296 = arith.cmpi eq, %269, %295 : vector<1x8xi32>
    %297 = vector.broadcast %268 : f32 to vector<1x8xf32>
    %298 = arith.select %296, %297, %294 : vector<1x8xi1>, vector<1x8xf32>
    %c0_100 = arith.constant 0 : index
    %c0_101 = arith.constant 0 : index
    %299 = vector.load %arg14[%c0_100, %c0_101] : memref<1x8xf32, #tpu.memory_space<vmem>>, vector<1x8xf32>
    tpu.vector_store %arg14[%c0_100, %c0_101], %298 {strides = array<i32>} : memref<1x8xf32, #tpu.memory_space<vmem>>, vector<1x8xf32>,
    return
  }
}

</mosaic_0001>

<bundles_post_ra>
// kernel: tpu_custom_call.1
= control target key start
LH: loop header
LB: loop body
LE: loop exit
PB: predicated region body
PF: predicated region fallthrough
CT: control target
= control target key end

     0   :  { %19 = vsyncpa [#allocation3], 0  ;;  %s3193_s0 = inlined_call_operand.vmem [shape: s32[8,16], index: 0, kind: input, shape index: {}]   ;;  %s3194_s1 = inlined_call_operand.vmem [shape: f32[8,16], index: 1, kind: input, shape index: {}]   ;;  %s3195_s2 = inlined_call_operand.hbm [shape: s32[8,16], index: 2, kind: input, shape index: {}]   ;;  %s3196_s3 = inlined_call_operand.vmem [shape: f32[8,16], index: 3, kind: input, shape index: {}]   ;;  %s3197_s4 = inlined_call_operand.hbm [shape: s32[8,16], index: 4, kind: input, shape index: {}]   ;;  %s3198_s5 = inlined_call_operand.vmem [shape: f32[8,16], index: 5, kind: input, shape index: {}]   ;;  %s3199_s6 = inlined_call_operand.vmem [shape: f32[100,64], index: 6, kind: input, shape index: {}]   ;;  %s3200_s7 = inlined_call_operand.vmem [shape: f32[64,64], index: 7, kind: input, shape index: {}]   ;;  %s3201_s8 = inlined_call_operand.vmem [shape: f32[1,64], index: 8, kind: input, shape index: {}]   ;;  %s3202_s9 = inlined_call_operand.vmem [shape: f32[100,64], index: 9, kind: input, shape index: {}]   ;;  %s3203_s10 = inlined_call_operand.vmem [shape: f32[64,64], index: 10, kind: input, shape index: {}]   ;;  %s3204_s11 = inlined_call_operand.vmem [shape: f32[1,64], index: 11, kind: input, shape index: {}]   ;;  %s3205_s12 = inlined_call_operand.vmem [shape: f32[64,128], index: 12, kind: input, shape index: {}]   ;;  %s3206_s13 = inlined_call_operand.vmem [shape: f32[64,128], index: 13, kind: input, shape index: {}]   ;;  %s3207_s14 = inlined_call_operand.hbm [shape: f32[1,8], index: 14, kind: output, shape index: {}]  }
   0x1   :  { %20 = vsyncpa [#allocation6], 0 }
   0x2   :  { %21 = vsyncpa [#allocation4], 0  ;;  %s2319_s29 = smov [#allocation2]   ;;  %s2320_s15 = smov [#allocation5]  }
   0x3   :  { %s32_s30 = sshll.u32 %s2319_s29, 4  ;;  %s44_s16 = sshll.u32 %s2320_s15, 4  ;;  %s33_s30 = int_to_ptr.vmem [resolvable:$true] %s32_s30  ;;  %s45_s16 = int_to_ptr.vmem [resolvable:$true] %s44_s16 }
   0x4   :  { %s2247_s19 = scalar_lea.hbm %s3195_s2, 128 }
   0x5   :  { %p2248_p0 = scmp.ne.s32.totalorder %s3195_s2, %s2247_s19  ;;  %p2251_p1 = scmp.lt.u32.totalorder %s2247_s19, %s3195_s2 }
   0x7   :  { %p2253_p2 = pnand %p2251_p1, %p2248_p0 }
   0x9   :  { %2256 = shalt.err (!%p2253_p2)
}
   0xa   :  { %s2257_s24 = scalar_lea.vmem %s33_s30, 128  ;;  %p2262_p4 = scmp.lt.s32.totalorder %s33_s30, %s33_s30 }
   0xb   :  { %p2258_p3 = scmp.ne.s32.totalorder %s33_s30, %s2257_s24  ;;  %p2263_p5 = scmp.lt.s32.totalorder %s2257_s24, %s2257_s24 }
   0xd   :  { %p2264_p6 = por %p2263_p5, %p2262_p4 }
   0xf   :  { %p2265_p7 = pnand %p2264_p6, %p2258_p3 }
  0x11   :  { %2268 = shalt.err (!%p2265_p7)
}
  0x12   :  { %35 = dma.hbm_to_vmem [thread:$0]  %s3195_s2, 128, %s33_s30, [#allocation3]  }
  0x13   :  { %s2269_s29 = scalar_lea.hbm %s3197_s4, 128 }
  0x14   :  { %p2270_p8 = scmp.ne.s32.totalorder %s3197_s4, %s2269_s29  ;;  %p2273_p9 = scmp.lt.u32.totalorder %s2269_s29, %s3197_s4 }
  0x16   :  { %p2275_p10 = pnand %p2273_p9, %p2270_p8 }
  0x18   :  { %2278 = shalt.err (!%p2275_p10)
}
  0x19   :  { %s2279_s20 = scalar_lea.vmem %s45_s16, 128  ;;  %p2284_p12 = scmp.lt.s32.totalorder %s45_s16, %s45_s16 }
  0x1a   :  { %p2280_p11 = scmp.ne.s32.totalorder %s45_s16, %s2279_s20  ;;  %p2285_p13 = scmp.lt.s32.totalorder %s2279_s20, %s2279_s20 }
  0x1c   :  { %p2286_p0 = por %p2285_p13, %p2284_p12 }
  0x1e   :  { %p2287_p1 = pnand %p2286_p0, %p2280_p11 }
  0x20   :  { %2290 = shalt.err (!%p2287_p1)
}
  0x21   :  { %47 = dma.hbm_to_vmem [thread:$0]  %s3197_s4, 128, %s45_s16, [#allocation6]  }
  0x22   :  { %2313 = dma.done.wait [#allocation3], 128  }
  0x23   :  { %2314 = vsyncadd [#allocation3], 4294967168 }
  0x24   :  { %2315 = dma.done.wait [#allocation6], 128  }
  0x25   :  { %2316 = vsyncadd [#allocation6], 4294967168  ;;  %v96_v0 = vlaneseq  ;;  %v72_v4 = vld [vmem:[%s3193_s0] sm:$0xff]  ;;  %v75_v23 = vld [vmem:[%s3199_s6 + $0x8] sm:$0xff]  ;;  %v2321_v25 = vmov 0.0|0.0   ;;  %vm2322_vm0 = vmmov 0  }
  0x26   :  { %v2444_v11 = vld [vmem:[%s3194_s1] sm:$0xff]  ;;  %2102 = vmatprep.subr.bf16.mxu0 %v2321_v25  ;;  %2120 = vmatprep.subr.bf16.mxu1 %v2321_v25  ;;  %v76_v28 = vld [vmem:[%s3199_s6 + $0x10] sm:$0xff]  ;;  %v77_v29 = vld [vmem:[%s3199_s6 + $0x18] sm:$0xff]  ;;  %v2323_v49 = vmov 0.0   ;;  %vm435_vm1 = vcmask 1043456   ;;  %vm509_vm2 = vcmask 130048  }
  0x27   :  { %v99_v1 = vshrl.u32 %v96_v0, 7  ;;  %v74_v22 = vld [vmem:[%s3199_s6] sm:$0xff]  ;;  %v2106_v30 = vpack.c.bf16 %v77_v29, %v76_v28  ;;  %v79_v33 = vld [vmem:[%s3199_s6 + $0x28] sm:$0xff]  ;;  %v80_v36 = vld [vmem:[%s3199_s6 + $0x30] sm:$0xff]  ;;  %2032 = vmatprep.mubr.msk.f32.mxu0 %vm2322_vm0, %v2323_v49  ;;  %2051 = vmatprep.mubr.msk.f32.mxu1 %vm2322_vm0, %v2323_v49  ;;  %v510_v55 = vsel %vm509_vm2, %v2444_v11, 0.0  ;;  %v2577_v29 = vand.u32 127, %v96_v0 }
  0x28   :  { %v2103_v24 = vpack.c.bf16 %v75_v23, %v74_v22  ;;  %v78_v32 = vld [vmem:[%s3199_s6 + $0x20] sm:$0xff]  ;;  %v81_v37 = vld [vmem:[%s3199_s6 + $0x38] sm:$0xff]  ;;  %v83_v41 = vld [vmem:[%s3199_s6 + $0x48] sm:$0xff]  ;;  %vm338_vm11 = vcmask 818176   ;;  %s2325_s1 = smov [#allocation7]  }
  0x29   :  { %v2426_v2 = vsub.s32 1, %v99_v1  ;;  %v2428_v3 = vsub.s32 0, %v99_v1  ;;  %v2435_v7 = vsub.s32 2, %v99_v1  ;;  %v2438_v9 = vsub.s32 3, %v99_v1  ;;  %v82_v40 = vld [vmem:[%s3199_s6 + $0x40] sm:$0xff]  ;;  %v84_v45 = vld [vmem:[%s3199_s6 + $0x50] sm:$0xff] }
  0x2a   :  { %v2450_v14 = vsub.s32 4, %v99_v1  ;;  %v2455_v17 = vsub.s32 5, %v99_v1  ;;  %v2460_v20 = vsub.s32 6, %v99_v1  ;;  %v2473_v27 = vsub.s32 7, %v99_v1  ;;  %2104 = vmatpush3.bf16.msra.mxu0 %v2103_v24  ;;  %v2510_v44 = vld [vmem:[#allocation2] sm:$0xff]  ;;  %v85_v46 = vld [vmem:[%s3199_s6 + $0x58] sm:$0xff] }
  0x2b   :  { %v112_v5 = vrot.slane %v72_v4, %v2426_v2  ;;  %v101_v6 = vrot.slane %v72_v4, %v2428_v3  ;;  %v123_v8 = vrot.slane %v72_v4, %v2435_v7  ;;  %v134_v10 = vrot.slane %v72_v4, %v2438_v9  ;;  %2105 = vmatprep.subr.bf16.mxu0 %v2321_v25  ;;  %v86_v50 = vld [vmem:[%s3199_s6 + $0x60] sm:$0xf]  ;;  %v2532_v53 = vld [vmem:[#allocation5] sm:$0xff]  ;;  %s2324_s6 = smov 1.0  }
  0x2c   :  { %v237_v12 = vrot.slane %v2444_v11, %v2428_v3  ;;  %v248_v13 = vrot.slane %v2444_v11, %v2426_v2  ;;  %v145_v15 = vrot.slane %v72_v4, %v2450_v14  ;;  %v259_v16 = vrot.slane %v2444_v11, %v2435_v7  ;;  %v2547_v59 = vld [vmem:[%s3196_s3] sm:$0xff] }
  0x2d   :  { %114 = vbcast.lane.b32.xlu1 %v112_v5, 256  ;;  %103 = vbcast.lane.b32.xlu0 %v101_v6, 256  ;;  %v156_v18 = vrot.slane %v72_v4, %v2455_v17  ;;  %v270_v19 = vrot.slane %v2444_v11, %v2438_v9  ;;  %v167_v21 = vrot.slane %v72_v4, %v2460_v20 }
  0x2e   :  { %v281_v26 = vrot.slane %v2444_v11, %v2450_v14  ;;  %v178_v31 = vrot.slane %v72_v4, %v2473_v27  ;;  %2107 = vmatpush3.bf16.msra.mxu0 %v2106_v30  ;;  %v2109_v34 = vpack.c.bf16 %v79_v33, %v78_v32  ;;  %v292_v35 = vrot.slane %v2444_v11, %v2455_v17 }
  0x2f   :  { %2108 = vmatprep.subr.bf16.mxu0 %v2321_v25  ;;  %v2112_v38 = vpack.c.bf16 %v81_v37, %v80_v36  ;;  %v303_v39 = vrot.slane %v2444_v11, %v2460_v20  ;;  %v2115_v42 = vpack.c.bf16 %v83_v41, %v82_v40  ;;  %v314_v43 = vrot.slane %v2444_v11, %v2473_v27 }
  0x30   :  { %v2118_v47 = vpack.c.bf16 %v85_v46, %v84_v45  ;;  %v632_v48 = vrot.slane %v2510_v44, %v2428_v3  ;;  %v643_v51 = vrot.slane %v2510_v44, %v2426_v2  ;;  %v654_v52 = vrot.slane %v2510_v44, %v2435_v7 }
  0x31   :  { %118 = vbcast.lane.b32.xlu1 %v112_v5, 264  ;;  %107 = vbcast.lane.b32.xlu0 %v101_v6, 264  ;;  %v720_v54 = vrot.slane %v2532_v53, %v2428_v3  ;;  %v731_v56 = vrot.slane %v2532_v53, %v2426_v2  ;;  %v665_v57 = vrot.slane %v2510_v44, %v2438_v9 }
  0x32   :  { %2110 = vmatpush3.bf16.msra.mxu0 %v2109_v34  ;;  %v742_v58 = vrot.slane %v2532_v53, %v2435_v7  ;;  %v904_v60 = vrot.slane %v2547_v59, %v2428_v3  ;;  %v915_v63 = vrot.slane %v2547_v59, %v2426_v2  ;;  %v676_v5 = vrot.slane %v2510_v44, %v2450_v14 }
  0x33   :  { %2111 = vmatprep.subr.bf16.mxu0 %v2321_v25  ;;  %v687_v28 = vrot.slane %v2510_v44, %v2455_v17  ;;  %v937_v0 = vrot.slane %v2547_v59, %v2438_v9 }
  0x35   :  { %129 = vbcast.lane.b32.xlu1 %v123_v8, 264  ;;  %125 = vbcast.lane.b32.xlu0 %v123_v8, 256 }
  0x36   :  { %2113 = vmatpush3.bf16.msra.mxu0 %v2112_v38 }
  0x37   :  { %2114 = vmatprep.subr.bf16.mxu0 %v2321_v25 }
  0x39   :  { %140 = vbcast.lane.b32.xlu1 %v134_v10, 264  ;;  %136 = vbcast.lane.b32.xlu0 %v134_v10, 256  ;;  %v753_v10 = vrot.slane %v2532_v53, %v2438_v9 }
  0x3a   :  { %2116 = vmatpush3.bf16.msra.mxu0 %v2115_v42 }
  0x3b   :  { %2117 = vmatprep.subr.bf16.mxu0 %v2321_v25 }
  0x3d   :  { %243 = vbcast.lane.b32.xlu1 %v237_v12, 264  ;;  %239 = vbcast.lane.b32.xlu0 %v237_v12, 256 }
  0x3e   :  { %2119 = vmatpush3.bf16.msra.mxu0 %v2118_v47 }
  0x3f   :  { %2030 = vmatprep.subr.mxu0 %v2323_v49 }
  0x41   :  { %254 = vbcast.lane.b32.xlu1 %v248_v13, 264  ;;  %250 = vbcast.lane.b32.xlu0 %v248_v13, 256  ;;  %v926_v13 = vrot.slane %v2547_v59, %v2435_v7 }
  0x42   :  { %2031 = vmatpush3.msk.msra.mxu0 %vm435_vm1, %v86_v50 }
  0x45   :  { %151 = vbcast.lane.b32.xlu1 %v145_v15, 264  ;;  %147 = vbcast.lane.b32.xlu0 %v145_v15, 256  ;;  %v2564_v15 = vld [vmem:[%s3198_s5] sm:$0xff] }
  0x46   :  { %v1003_v23 = vrot.slane %v2564_v15, %v2426_v2  ;;  %v1014_v45 = vrot.slane %v2564_v15, %v2435_v7 }
  0x49   :  { %265 = vbcast.lane.b32.xlu1 %v259_v16, 264  ;;  %261 = vbcast.lane.b32.xlu0 %v259_v16, 256 }
  0x4d   :  { %162 = vbcast.lane.b32.xlu1 %v156_v18, 264  ;;  %158 = vbcast.lane.b32.xlu0 %v156_v18, 256 }
  0x51   :  { %276 = vbcast.lane.b32.xlu1 %v270_v19, 264  ;;  %272 = vbcast.lane.b32.xlu0 %v270_v19, 256  ;;  %v992_v19 = vrot.slane %v2564_v15, %v2428_v3 }
  0x55   :  { %173 = vbcast.lane.b32.xlu1 %v167_v21, 264  ;;  %169 = vbcast.lane.b32.xlu0 %v167_v21, 256 }
  0x59   :  { %287 = vbcast.lane.b32.xlu1 %v281_v26, 264  ;;  %283 = vbcast.lane.b32.xlu0 %v281_v26, 256 }
  0x5d   :  { %184 = vbcast.lane.b32.xlu1 %v178_v31, 264  ;;  %180 = vbcast.lane.b32.xlu0 %v178_v31, 256  ;;  %v764_v31 = vrot.slane %v2532_v53, %v2450_v14 }
  0x61   :  { %298 = vbcast.lane.b32.xlu1 %v292_v35, 264  ;;  %294 = vbcast.lane.b32.xlu0 %v292_v35, 256 }
  0x65   :  { %309 = vbcast.lane.b32.xlu1 %v303_v39, 264  ;;  %305 = vbcast.lane.b32.xlu0 %v303_v39, 256 }
  0x69   :  { %320 = vbcast.lane.b32.xlu1 %v314_v43, 264  ;;  %316 = vbcast.lane.b32.xlu0 %v314_v43, 256 }
  0x6d   :  { %634 = vbcast.lane.b32.xlu1 %v632_v48, 256 }
  0x71   :  { %638 = vbcast.lane.b32.xlu1 %v632_v48, 264 }
  0x75   :  { %645 = vbcast.lane.b32.xlu1 %v643_v51, 256 }
  0x79   :  { %649 = vbcast.lane.b32.xlu1 %v643_v51, 264 }
  0x7d   :  { %656 = vbcast.lane.b32.xlu1 %v654_v52, 256 }
  0x81   :  { %660 = vbcast.lane.b32.xlu1 %v654_v52, 264 }
  0x85   :  { %722 = vbcast.lane.b32.xlu1 %v720_v54, 256 }
  0x88   :  { %511 = vadd.xlane.f32.xlu0 %v510_v55 }
  0x89   :  { %726 = vbcast.lane.b32.xlu1 %v720_v54, 264 }
  0x8d   :  { %737 = vbcast.lane.b32.xlu1 %v731_v56, 264 }
  0x91   :  { %667 = vbcast.lane.b32.xlu1 %v665_v57, 256 }
  0x95   :  { %671 = vbcast.lane.b32.xlu1 %v665_v57, 264 }
  0x99   :  { %744 = vbcast.lane.b32.xlu1 %v742_v58, 256 }
  0x9d   :  { %748 = vbcast.lane.b32.xlu1 %v742_v58, 264 }
  0x9e   :  { %733 = vbcast.lane.b32.xlu0 %v731_v56, 256 }
  0x9f   :  { %v115_v61 = vpop.permute.xlu1 %114  ;;  %v2551_v62 = vpop.permute.xlu0 %103 }
  0xa0   :  { %vm188_vm3 = vcmp.eq.s32.totalorder %v2577_v29, %v115_v61  ;;  %vm186_vm7 = vcmp.eq.s32.totalorder %v2577_v29, %v2551_v62  ;;  %v698_v62 = vrot.slane %v2510_v44, %v2460_v20 }
  0xa1   :  { %906 = vbcast.lane.b32.xlu1 %v904_v60, 256  ;;  %v1898_v34 = vsel %vm188_vm3, 1.0, %v2323_v49  ;;  %v1896_v47 = vsel %vm186_vm7, 1.0, %v2323_v49  ;;  %vm421_vm7 = vcmask 1042434  }
  0xa2   :  { %910 = vbcast.lane.b32.xlu0 %v904_v60, 264 }
  0xa3   :  { %v119_v1 = vpop.permute.xlu1 %118  ;;  %v108_v4 = vpop.permute.xlu0 %107 }
  0xa4   :  { %vm189_vm4 = vcmp.eq.s32.totalorder %v2577_v29, %v119_v1  ;;  %vm187_vm8 = vcmp.eq.s32.totalorder %v2577_v29, %v108_v4 }
  0xa5   :  { %917 = vbcast.lane.b32.xlu1 %v915_v63, 256  ;;  %v1899_v33 = vsel %vm189_vm4, 1.0, %v2323_v49  ;;  %v1897_v41 = vsel %vm187_vm8, 1.0, %v2323_v49  ;;  %vm423_vm8 = vcmask 1043459  }
  0xa6   :  { %921 = vbcast.lane.b32.xlu0 %v915_v63, 264 }
  0xa7   :  { %v130_v6 = vpop.permute.xlu1 %129  ;;  %v126_v8 = vpop.permute.xlu0 %125 }
  0xa8   :  { %vm191_vm5 = vcmp.eq.s32.totalorder %v2577_v29, %v130_v6  ;;  %vm190_vm6 = vcmp.eq.s32.totalorder %v2577_v29, %v126_v8 }
  0xa9   :  { %678 = vbcast.lane.b32.xlu1 %v676_v5, 256  ;;  %v1901_v37 = vsel %vm191_vm5, 1.0, %v2323_v49  ;;  %v1900_v38 = vsel %vm190_vm6, 1.0, %v2323_v49  ;;  %vm419_vm6 = vcmask 1041409  }
  0xaa   :  { %682 = vbcast.lane.b32.xlu0 %v676_v5, 264 }
  0xab   :  { %v141_v11 = vpop.permute.xlu1 %140  ;;  %v137_v12 = vpop.permute.xlu0 %136 }
  0xac   :  { %vm193_vm9 = vcmp.eq.s32.totalorder %v2577_v29, %v141_v11  ;;  %vm192_vm10 = vcmp.eq.s32.totalorder %v2577_v29, %v137_v12 }
  0xad   :  { %755 = vbcast.lane.b32.xlu1 %v753_v10, 256  ;;  %v1903_v48 = vsel %vm193_vm9, 1.0, %v2323_v49  ;;  %v1902_v50 = vsel %vm192_vm10, 1.0, %v2323_v49  ;;  %vm425_vm9 = vcmask 1044484   ;;  %vm427_vm10 = vcmask 1045509  }
  0xae   :  { %759 = vbcast.lane.b32.xlu0 %v753_v10, 264 }
  0xaf   :  { %v244_v16 = vpop.permute.xlu1 %243  ;;  %v240_v18 = vpop.permute.xlu0 %239 }
  0xb0   :  { %v323_v46 = vmul.f32 %v1897_v41, %v244_v16  ;;  %v322_v51 = vmul.f32 %v1896_v47, %v240_v18 }
  0xb1   :  { %928 = vbcast.lane.b32.xlu1 %v926_v13, 256 }
  0xb2   :  { %932 = vbcast.lane.b32.xlu0 %v926_v13, 264  ;;  %v340_v61 = vsel %vm338_vm11, %v323_v46, 0.0  ;;  %v339_v63 = vsel %vm338_vm11, %v322_v51, 0.0 }
  0xb3   :  { %v255_v21 = vpop.permute.xlu1 %254  ;;  %v251_v22 = vpop.permute.xlu0 %250  ;;  %v341_v18 = vadd.f32 %v340_v61, %v339_v63 }
  0xb4   :  { %v325_v35 = vmul.f32 %v1899_v33, %v255_v21  ;;  %v324_v36 = vmul.f32 %v1898_v34, %v251_v22  ;;  %v775_v21 = vrot.slane %v2532_v53, %v2455_v17  ;;  %v948_v33 = vrot.slane %v2547_v59, %v2450_v14 }
  0xb5   :  { %994 = vbcast.lane.b32.xlu1 %v992_v19, 256 }
  0xb6   :  { %998 = vbcast.lane.b32.xlu0 %v992_v19, 264  ;;  %v349_v7 = vsel %vm338_vm11, %v325_v35, 0.0  ;;  %v348_v55 = vsel %vm338_vm11, %v324_v36, 0.0 }
  0xb7   :  { %v2570_v24 = vpop.permute.xlu1 %151  ;;  %v2572_v26 = vpop.permute.xlu0 %147  ;;  %v350_v1 = vadd.f32 %v349_v7, %v348_v55 }
  0xb8   :  { %vm195_vm12 = vcmp.eq.s32.totalorder %v2577_v29, %v2570_v24  ;;  %vm194_vm13 = vcmp.eq.s32.totalorder %v2577_v29, %v2572_v26 }
  0xb9   :  { %1005 = vbcast.lane.b32.xlu1 %v1003_v23, 256  ;;  %v1905_v8 = vsel %vm195_vm12, 1.0, %v2323_v49  ;;  %v1904_v11 = vsel %vm194_vm13, 1.0, %v2323_v49  ;;  %v351_v22 = vrot.slane %v350_v1, 4  ;;  %vm429_vm12 = vcmask 1046534  }
  0xba   :  { %1009 = vbcast.lane.b32.xlu0 %v1003_v23, 264  ;;  %vm431_vm13 = vcmask 1047559  }
  0xbb   :  { %v266_v3 = vpop.permute.xlu1 %265  ;;  %v262_v30 = vpop.permute.xlu0 %261  ;;  %v352_v34 = vadd.f32 %v351_v22, %v350_v1 }
  0xbc   :  { %v327_v42 = vmul.f32 %v1901_v37, %v266_v3  ;;  %v326_v43 = vmul.f32 %v1900_v38, %v262_v30 }
  0xbd   :  { %689 = vbcast.lane.b32.xlu1 %v687_v28, 256 }
  0xbe   :  { %693 = vbcast.lane.b32.xlu0 %v687_v28, 264  ;;  %v358_v58 = vsel %vm338_vm11, %v327_v42, 0.0  ;;  %v357_v60 = vsel %vm338_vm11, %v326_v43, 0.0  ;;  %v1025_v43 = vrot.slane %v2564_v15, %v2438_v9 }
  0xbf   :  { %v2583_v2 = vpop.permute.xlu1 %162  ;;  %v2585_v32 = vpop.permute.xlu0 %158  ;;  %v359_v6 = vadd.f32 %v358_v58, %v357_v60 }
  0xc0   :  { %vm197_vm14 = vcmp.eq.s32.totalorder %v2577_v29, %v2583_v2  ;;  %vm196_vm15 = vcmp.eq.s32.totalorder %v2577_v29, %v2585_v32 }
  0xc1   :  { %766 = vbcast.lane.b32.xlu1 %v764_v31, 256  ;;  %v360_v26 = vrot.slane %v359_v6, 4  ;;  %v1907_v37 = vsel %vm197_vm14, 1.0, %v2323_v49 }
  0xc2   :  { %770 = vbcast.lane.b32.xlu0 %v764_v31, 264  ;;  %v342_v31 = vrot.slane %v341_v18, 4 }
  0xc3   :  { %v277_v39 = vpop.permute.xlu1 %276  ;;  %v273_v40 = vpop.permute.xlu0 %272  ;;  %v361_v36 = vadd.f32 %v360_v26, %v359_v6 }
  0xc4   :  { %v329_v52 = vmul.f32 %v1903_v48, %v277_v39  ;;  %v328_v54 = vmul.f32 %v1902_v50, %v273_v40  ;;  %v1906_v39 = vsel %vm196_vm15, 1.0, %v2323_v49  ;;  %v343_v41 = vadd.f32 %v342_v31, %v341_v18 }
  0xc5   :  { %939 = vbcast.lane.b32.xlu1 %v937_v0, 256  ;;  %v362_v50 = vrot.slane %v361_v36, 2  ;;  %v786_v18 = vrot.slane %v2532_v53, %v2460_v20 }
  0xc6   :  { %943 = vbcast.lane.b32.xlu0 %v937_v0, 264  ;;  %v367_v4 = vsel %vm338_vm11, %v329_v52, 0.0  ;;  %v366_v5 = vsel %vm338_vm11, %v328_v54, 0.0  ;;  %v344_v58 = vrot.slane %v343_v41, 2 }
  0xc7   :  { %v2615_v56 = vpop.permute.xlu1 %173  ;;  %v2617_v57 = vpop.permute.xlu0 %169  ;;  %v368_v19 = vadd.f32 %v367_v4, %v366_v5 }
  0xc8   :  { %vm199_vm0 = vcmp.eq.s32.totalorder %v2577_v29, %v2615_v56  ;;  %vm198_vm3 = vcmp.eq.s32.totalorder %v2577_v29, %v2617_v57 }
  0xc9   :  { %1016 = vbcast.lane.b32.xlu1 %v1014_v45, 256  ;;  %v369_v0 = vrot.slane %v368_v19, 4  ;;  %v1909_v52 = vsel %vm199_vm0, 1.0, %v2323_v49  ;;  %v1908_v7 = vsel %vm198_vm3, 1.0, %v2323_v49 }
  0xca   :  { %1020 = vbcast.lane.b32.xlu0 %v1014_v45, 264  ;;  %v353_v45 = vrot.slane %v352_v34, 2 }
  0xcb   :  { %v288_v10 = vpop.permute.xlu1 %287  ;;  %v284_v12 = vpop.permute.xlu0 %283  ;;  %v370_v42 = vadd.f32 %v369_v0, %v368_v19  ;;  %v345_v19 = vadd.f32 %v344_v58, %v343_v41 }
  0xcc   :  { %v331_v13 = vmul.f32 %v1905_v8, %v288_v10  ;;  %v330_v16 = vmul.f32 %v1904_v11, %v284_v12  ;;  %v354_v63 = vadd.f32 %v353_v45, %v352_v34 }
  0xcd   :  { %700 = vbcast.lane.b32.xlu1 %v698_v62, 256  ;;  %v371_v60 = vrot.slane %v370_v42, 2 }
  0xce   :  { %v376_v23 = vsel %vm338_vm11, %v331_v13, 0.0  ;;  %v375_v24 = vsel %vm338_vm11, %v330_v16, 0.0  ;;  %704 = vbcast.lane.b32.xlu0 %v698_v62, 264  ;;  %v709_v62 = vrot.slane %v2510_v44, %v2473_v27  ;;  %v363_v44 = vadd.f32 %v362_v50, %v361_v36 }
  0xcf   :  { %v377_v28 = vadd.f32 %v376_v23, %v375_v24  ;;  %v185_v3 = vpop.permute.xlu1 %184  ;;  %v181_v30 = vpop.permute.xlu0 %180  ;;  %v346_v36 = vrot.slane %v345_v19, 1 }
  0xd0   :  { %vm201_vm4 = vcmp.eq.s32.totalorder %v2577_v29, %v185_v3  ;;  %vm200_vm5 = vcmp.eq.s32.totalorder %v2577_v29, %v181_v30  ;;  %v355_v3 = vrot.slane %v354_v63, 1  ;;  %v364_v34 = vrot.slane %v363_v44, 1 }
  0xd1   :  { %777 = vbcast.lane.b32.xlu1 %v775_v21, 256  ;;  %v378_v35 = vrot.slane %v377_v28, 4  ;;  %v1911_v8 = vsel %vm201_vm4, 1.0, %v2323_v49  ;;  %v1910_v11 = vsel %vm200_vm5, 1.0, %v2323_v49 }
  0xd2   :  { %781 = vbcast.lane.b32.xlu0 %v775_v21, 264  ;;  %v372_v21 = vadd.f32 %v371_v60, %v370_v42  ;;  %v365_v45 = vadd.f32 %v364_v34, %v363_v44  ;;  %v1058_v44 = vrot.slane %v2564_v15, %v2460_v20 }
  0xd3   :  { %v299_v38 = vpop.permute.xlu1 %298  ;;  %v295_v40 = vpop.permute.xlu0 %294  ;;  %v379_v46 = vadd.f32 %v378_v35, %v377_v28  ;;  %v959_v35 = vrot.slane %v2547_v59, %v2455_v17 }
  0xd4   :  { %v333_v2 = vmul.f32 %v1907_v37, %v299_v38  ;;  %v332_v32 = vmul.f32 %v1906_v39, %v295_v40  ;;  %v373_v37 = vrot.slane %v372_v21, 1 }
  0xd5   :  { %950 = vbcast.lane.b32.xlu1 %v948_v33, 256  ;;  %v380_v1 = vrot.slane %v379_v46, 2 }
  0xd6   :  { %v385_v47 = vsel %vm338_vm11, %v333_v2, 0.0  ;;  %v384_v48 = vsel %vm338_vm11, %v332_v32, 0.0  ;;  %954 = vbcast.lane.b32.xlu0 %v948_v33, 264  ;;  %v356_v2 = vadd.f32 %v355_v3, %v354_v63 }
  0xd7   :  { %v386_v51 = vadd.f32 %v385_v47, %v384_v48  ;;  %v310_v54 = vpop.permute.xlu1 %309  ;;  %v306_v55 = vpop.permute.xlu0 %305  ;;  %v381_v24 = vadd.f32 %v380_v1, %v379_v46  ;;  %v1036_v46 = vrot.slane %v2564_v15, %v2450_v14  ;;  %v347_v47 = vadd.f32 %v346_v36, %v345_v19 }
  0xd8   :  { %v335_v9 = vmul.f32 %v1909_v52, %v310_v54  ;;  %v334_v56 = vmul.f32 %v1908_v7, %v306_v55  ;;  %v374_v48 = vadd.f32 %v373_v37, %v372_v21  ;;  %v93_v37 = vld [vmem:[%s3200_s7 + $0x30] sm:$0xff] }
  0xd9   :  { %v387_v61 = vrot.slane %v386_v51, 4  ;;  %1027 = vbcast.lane.b32.xlu1 %v1025_v43, 256  ;;  %v382_v40 = vrot.slane %v381_v24, 1  ;;  %v420_v54 = vsel %vm419_vm6, %v356_v2, %v347_v47 }
  0xda   :  { %v394_v4 = vsel %vm338_vm11, %v335_v9, 0.0  ;;  %v393_v57 = vsel %vm338_vm11, %v334_v56, 0.0  ;;  %1031 = vbcast.lane.b32.xlu0 %v1025_v43, 264  ;;  %v422_v56 = vsel %vm421_vm7, %v365_v45, %v420_v54 }
  0xdb   :  { %v388_v5 = vadd.f32 %v387_v61, %v386_v51  ;;  %v395_v6 = vadd.f32 %v394_v4, %v393_v57  ;;  %v321_v10 = vpop.permute.xlu1 %320  ;;  %v317_v12 = vpop.permute.xlu0 %316  ;;  %v383_v52 = vadd.f32 %v382_v40, %v381_v24  ;;  %v424_v60 = vsel %vm423_vm8, %v374_v48, %v422_v56  ;;  %v90_v24 = vld [vmem:[%s3200_s7 + $0x18] sm:$0xff] }
  0xdc   :  { %v337_v13 = vmul.f32 %v1911_v8, %v321_v10  ;;  %v336_v16 = vmul.f32 %v1910_v11, %v317_v12  ;;  %v797_v61 = vrot.slane %v2532_v53, %v2473_v27  ;;  %v1047_v8 = vrot.slane %v2564_v15, %v2455_v17 }
  0xdd   :  { %v389_v22 = vrot.slane %v388_v5, 2  ;;  %v396_v23 = vrot.slane %v395_v6, 4  ;;  %711 = vbcast.lane.b32.xlu1 %v709_v62, 256  ;;  %v981_v11 = vrot.slane %v2547_v59, %v2473_v27  ;;  %v1069_v17 = vrot.slane %v2564_v15, %v2473_v27  ;;  %v89_v27 = vld [vmem:[%s3200_s7 + $0x10] sm:$0xff] }
  0xde   :  { %v403_v26 = vsel %vm338_vm11, %v337_v13, 0.0  ;;  %v402_v28 = vsel %vm338_vm11, %v336_v16, 0.0  ;;  %715 = vbcast.lane.b32.xlu0 %v709_v62, 264  ;;  %v426_v62 = vsel %vm425_vm9, %v383_v52, %v424_v60 }
  0xdf   :  { %v390_v30 = vadd.f32 %v389_v22, %v388_v5  ;;  %v397_v31 = vadd.f32 %v396_v23, %v395_v6  ;;  %v404_v0 = vadd.f32 %v403_v26, %v402_v28  ;;  %v2674_v33 = vpop.permute.xlu1 %634  ;;  %v970_v6 = vrot.slane %v2547_v59, %v2460_v20  ;;  %v87_v20 = vld [vmem:[%s3200_s7] sm:$0xff]  ;;  %v88_v22 = vld [vmem:[%s3200_s7 + $0x8] sm:$0xff] }
  0xe0   :  { %vm805_vm14 = vcmp.eq.s32.totalorder %v2577_v29, %v2674_v33  ;;  %v2121_v23 = vpack.c.bf16 %v88_v22, %v87_v20  ;;  %v2124_v28 = vpack.c.bf16 %v90_v24, %v89_v27 }
  0xe1   :  { %v398_v38 = vrot.slane %v397_v31, 2  ;;  %v405_v39 = vrot.slane %v404_v0, 4  ;;  %788 = vbcast.lane.b32.xlu1 %v786_v18, 256  ;;  %v391_v32 = vrot.slane %v390_v30, 1  ;;  %v1916_v3 = vsel %vm805_vm14, 1.0, %v2323_v49 }
  0xe2   :  { %792 = vbcast.lane.b32.xlu0 %v786_v18, 264  ;;  %2122 = vmatpush3.bf16.msra.mxu1 %v2121_v23 }
  0xe3   :  { %v399_v41 = vadd.f32 %v398_v38, %v397_v31  ;;  %v406_v42 = vadd.f32 %v405_v39, %v404_v0  ;;  %v2678_v43 = vpop.permute.xlu1 %638  ;;  %v392_v7 = vadd.f32 %v391_v32, %v390_v30  ;;  %2123 = vmatprep.subr.bf16.mxu1 %v2321_v25  ;;  %v91_v30 = vld [vmem:[%s3200_s7 + $0x20] sm:$0xff]  ;;  %v92_v31 = vld [vmem:[%s3200_s7 + $0x28] sm:$0xff]  ;;  %v94_v38 = vld [vmem:[%s3200_s7 + $0x38] sm:$0xff] }
  0xe4   :  { %v2127_v34 = vpack.c.bf16 %v92_v31, %v91_v30  ;;  %vm806_vm0 = vcmp.eq.s32.totalorder %v2577_v29, %v2678_v43  ;;  %v2130_v2 = vpack.c.bf16 %v94_v38, %v93_v37 }
  0xe5   :  { %v400_v50 = vrot.slane %v399_v41, 1  ;;  %v407_v51 = vrot.slane %v406_v42, 2  ;;  %961 = vbcast.lane.b32.xlu1 %v959_v35, 256  ;;  %v428_v1 = vsel %vm427_vm10, %v392_v7, %v426_v62 }
  0xe6   :  { %965 = vbcast.lane.b32.xlu0 %v959_v35, 264  ;;  %2125 = vmatpush3.bf16.msra.mxu1 %v2124_v28 }
  0xe7   :  { %v408_v55 = vadd.f32 %v407_v51, %v406_v42  ;;  %v2683_v9 = vpop.permute.xlu1 %645  ;;  %v401_v58 = vadd.f32 %v400_v50, %v399_v41  ;;  %2126 = vmatprep.subr.bf16.mxu1 %v2321_v25  ;;  %v1917_v41 = vsel %vm806_vm0, 1.0, %v2323_v49 }
  0xe8   :  { %vm807_vm15 = vcmp.eq.s32.totalorder %v2577_v29, %v2683_v9 }
  0xe9   :  { %v409_v14 = vrot.slane %v408_v55, 1  ;;  %1038 = vbcast.lane.b32.xlu1 %v1036_v46, 256  ;;  %v430_v57 = vsel %vm429_vm12, %v401_v58, %v428_v1  ;;  %v1918_v36 = vsel %vm807_vm15, 1.0, %v2323_v49 }
  0xea   :  { %1042 = vbcast.lane.b32.xlu0 %v1036_v46, 264  ;;  %2128 = vmatpush3.bf16.msra.mxu1 %v2127_v34 }
  0xeb   :  { %v410_v63 = vadd.f32 %v409_v14, %v408_v55  ;;  %v2691_v4 = vpop.permute.xlu1 %649  ;;  %2129 = vmatprep.subr.bf16.mxu1 %v2321_v25 }
  0xec   :  { %vm808_vm3 = vcmp.eq.s32.totalorder %v2577_v29, %v2691_v4 }
  0xed   :  { %v432_v5 = vsel %vm431_vm13, %v410_v63, %v430_v57  ;;  %799 = vbcast.lane.b32.xlu1 %v797_v61, 256  ;;  %v1919_v47 = vsel %vm808_vm3, 1.0, %v2323_v49 }
  0xee   :  { %2033 = vmatmul.mubr.msk.f32.vlgmr.msra.gmra.mrb[0].mxu0 %vm338_vm11, %v432_v5  ;;  %803 = vbcast.lane.b32.xlu0 %v797_v61, 264 }
  0xef   :  { %v2698_v53 = vpop.permute.xlu1 %656  ;;  %2131 = vmatpush3.bf16.msra.mxu1 %v2130_v2 }
  0xf0   :  { %vm809_vm4 = vcmp.eq.s32.totalorder %v2577_v29, %v2698_v53 }
  0xf1   :  { %972 = vbcast.lane.b32.xlu1 %v970_v6, 256  ;;  %v1920_v52 = vsel %vm809_vm4, 1.0, %v2323_v49 }
  0xf2   :  { %976 = vbcast.lane.b32.xlu0 %v970_v6, 264 }
  0xf3   :  { %v2702_v10 = vpop.permute.xlu1 %660 }
  0xf4   :  { %vm810_vm15 = vcmp.eq.s32.totalorder %v2577_v29, %v2702_v10 }
  0xf5   :  { %1049 = vbcast.lane.b32.xlu1 %v1047_v8, 256 }
  0xf6   :  { %1053 = vbcast.lane.b32.xlu0 %v1047_v8, 264 }
  0xf7   :  { %v2706_v12 = vpop.permute.xlu1 %722 }
  0xf8   :  { %vm821_vm5 = vcmp.eq.s32.totalorder %v2577_v29, %v2706_v12 }
  0xf9   :  { %983 = vbcast.lane.b32.xlu1 %v981_v11, 256  ;;  %v1932_v62 = vsel %vm821_vm5, 1.0, %v2323_v49 }
  0xfa   :  { %987 = vbcast.lane.b32.xlu0 %v981_v11, 264 }
  0xfb   :  { %v2710_v13 = vpop.permute.xlu1 %726 }
  0xfc   :  { %vm822_vm0 = vcmp.eq.s32.totalorder %v2577_v29, %v2710_v13 }
  0xfd   :  { %1060 = vbcast.lane.b32.xlu1 %v1058_v44, 256 }
  0xfe   :  { %1064 = vbcast.lane.b32.xlu0 %v1058_v44, 264  ;;  %v1921_v44 = vsel %vm810_vm15, 1.0, %v2323_v49 }
  0xff   :  { %v2714_v16 = vpop.permute.xlu1 %737 }
 0x100   :  { %vm824_vm3 = vcmp.eq.s32.totalorder %v2577_v29, %v2714_v16 }
 0x101   :  { %1071 = vbcast.lane.b32.xlu1 %v1069_v17, 256 }
 0x102   :  { %1075 = vbcast.lane.b32.xlu0 %v1069_v17, 264 }
 0x103   :  { %v2716_v18 = vpop.permute.xlu1 %667 }
 0x104   :  { %vm811_vm5 = vcmp.eq.s32.totalorder %v2577_v29, %v2716_v18 }
 0x107   :  { %v2718_v19 = vpop.permute.xlu1 %671 }
 0x10b   :  { %v2720_v21 = vpop.permute.xlu1 %744 }
 0x10c   :  { %vm825_vm4 = vcmp.eq.s32.totalorder %v2577_v29, %v2720_v21 }
 0x10f   :  { %v2736_v26 = vpop.permute.xlu1 %748 }
 0x110   :  { %vm826_vm15 = vcmp.eq.s32.totalorder %v2577_v29, %v2736_v26 }
 0x113   :  { %v907_v0 = vpop.permute.xlu1 %906 }
 0x114   :  { %v1077_v33 = vmul.f32 %v1916_v3, %v907_v0  ;;  %v1933_v3 = vsel %vm822_vm0, 1.0, %v2323_v49 }
 0x115   :  { %v2748_v35 = vpop.xlane.xlu0 %511 }
 0x116   :  { %v1109_v43 = vsel %vm338_vm11, %v1077_v33, 0.0 }
 0x117   :  { %v918_v39 = vpop.permute.xlu1 %917 }
 0x118   :  { %v1079_v40 = vmul.f32 %v1918_v36, %v918_v39  ;;  %v1935_v39 = vsel %vm824_vm3, 1.0, %v2323_v49 }
 0x119   :  { %v734_v32 = vpop.permute.xlu0 %733 }
 0x11a   :  { %v1118_v54 = vsel %vm338_vm11, %v1079_v40, 0.0  ;;  %vm823_vm14 = vcmp.eq.s32.totalorder %v2577_v29, %v734_v32 }
 0x11b   :  { %v2762_v42 = vpop.permute.xlu1 %678  ;;  %v1934_v8 = vsel %vm823_vm14, 1.0, %v2323_v49  ;;  %vm812_vm14 = vcmp.eq.s32.totalorder %v2577_v29, %v2718_v19  ;;  %v607_v19 = vld [vmem:[%s3202_s9] sm:$0xff] }
 0x11c   :  { %vm813_vm0 = vcmp.eq.s32.totalorder %v2577_v29, %v2762_v42 }
 0x11d   :  { %v911_v45 = vpop.permute.xlu0 %910 }
 0x11e   :  { %v1078_v46 = vmul.f32 %v1917_v41, %v911_v45 }
 0x11f   :  { %v2770_v48 = vpop.permute.xlu1 %755 }
 0x120   :  { %v1110_v25 = vsel %vm338_vm11, %v1078_v46, 0.0 }
 0x121   :  { %v1111_v50 = vadd.f32 %v1110_v25, %v1109_v43  ;;  %v922_v51 = vpop.permute.xlu0 %921 }
 0x122   :  { %v1080_v7 = vmul.f32 %v1919_v47, %v922_v51 }
 0x123   :  { %v1112_v55 = vrot.slane %v1111_v50, 4  ;;  %v929_v9 = vpop.permute.xlu1 %928 }
 0x124   :  { %v1119_v56 = vsel %vm338_vm11, %v1080_v7, 0.0  ;;  %v1081_v58 = vmul.f32 %v1920_v52, %v929_v9 }
 0x125   :  { %v1113_v14 = vadd.f32 %v1112_v55, %v1111_v50  ;;  %v1120_v60 = vadd.f32 %v1119_v56, %v1118_v54  ;;  %v2778_v61 = vpop.permute.xlu0 %682  ;;  %v1936_v55 = vsel %vm825_vm4, 1.0, %v2323_v49 }
 0x126   :  { %v1127_v10 = vsel %vm338_vm11, %v1081_v58, 0.0  ;;  %v1922_v58 = vsel %vm811_vm5, 1.0, %v2323_v49  ;;  %vm814_vm3 = vcmp.eq.s32.totalorder %v2577_v29, %v2778_v61 }
 0x127   :  { %v1114_v63 = vrot.slane %v1113_v14, 2  ;;  %v1121_v1 = vrot.slane %v1120_v60, 4  ;;  %v995_v4 = vpop.permute.xlu1 %994 }
 0x128   :  { %v1093_v57 = vmul.f32 %v1932_v62, %v995_v4 }
 0x129   :  { %v1115_v5 = vadd.f32 %v1114_v63, %v1113_v14  ;;  %v1122_v6 = vadd.f32 %v1121_v1, %v1120_v60  ;;  %v2784_v53 = vpop.permute.xlu0 %759 }
 0x12a   :  { %v1181_v34 = vsel %vm338_vm11, %v1093_v57, 0.0  ;;  %vm828_vm4 = vcmp.eq.s32.totalorder %v2577_v29, %v2784_v53 }
 0x12b   :  { %v1116_v11 = vrot.slane %v1115_v5, 1  ;;  %v1123_v12 = vrot.slane %v1122_v6, 2  ;;  %v1006_v17 = vpop.permute.xlu1 %1005 }
 0x12c   :  { %v1095_v20 = vmul.f32 %v1934_v8, %v1006_v17  ;;  %v1923_v8 = vsel %vm812_vm14, 1.0, %v2323_v49 }
 0x12d   :  { %v1124_v22 = vadd.f32 %v1123_v12, %v1122_v6  ;;  %v933_v27 = vpop.permute.xlu0 %932  ;;  %v1117_v24 = vadd.f32 %v1116_v11, %v1115_v5  ;;  %v608_v12 = vld [vmem:[%s3202_s9 + $0x8] sm:$0xff] }
 0x12e   :  { %v1082_v23 = vmul.f32 %v1921_v44, %v933_v27  ;;  %v1190_v45 = vsel %vm338_vm11, %v1095_v20, 0.0  ;;  %v2829_v20 = vpack.c.bf16 %v608_v12, %v607_v19 }
 0x12f   :  { %v1125_v28 = vrot.slane %v1124_v22, 1  ;;  %v2792_v30 = vpop.permute.xlu1 %689 }
 0x130   :  { %v1128_v31 = vsel %vm338_vm11, %v1082_v23, 0.0  ;;  %2133 = vmatprep.subr.bf16.mxu1 %v2829_v20 }
 0x131   :  { %v1126_v0 = vadd.f32 %v1125_v28, %v1124_v22  ;;  %v1129_v33 = vadd.f32 %v1128_v31, %v1127_v10  ;;  %v999_v13 = vpop.permute.xlu0 %998 }
 0x132   :  { %v1094_v36 = vmul.f32 %v1933_v3, %v999_v13 }
 0x133   :  { %v1269_v37 = vsel %vm419_vm6, %v1126_v0, %v1117_v24  ;;  %v1130_v38 = vrot.slane %v1129_v33, 4  ;;  %v2800_v40 = vpop.permute.xlu1 %766  ;;  %v1937_v24 = vsel %vm826_vm15, 1.0, %v2323_v49 }
 0x134   :  { %v1182_v2 = vsel %vm338_vm11, %v1094_v36, 0.0  ;;  %vm829_vm5 = vcmp.eq.s32.totalorder %v2577_v29, %v2800_v40 }
 0x135   :  { %v1131_v32 = vadd.f32 %v1130_v38, %v1129_v33  ;;  %v1183_v41 = vadd.f32 %v1182_v2, %v1181_v34  ;;  %v1010_v16 = vpop.permute.xlu0 %1009 }
 0x136   :  { %v1096_v43 = vmul.f32 %v1935_v39, %v1010_v16 }
 0x137   :  { %v1132_v46 = vrot.slane %v1131_v32, 2  ;;  %v1184_v47 = vrot.slane %v1183_v41, 4  ;;  %v940_v25 = vpop.permute.xlu1 %939 }
 0x138   :  { %v1191_v50 = vsel %vm338_vm11, %v1096_v43, 0.0  ;;  %v1083_v4 = vmul.f32 %v1922_v58, %v940_v25 }
 0x139   :  { %v1133_v51 = vadd.f32 %v1132_v46, %v1131_v32  ;;  %v1185_v52 = vadd.f32 %v1184_v47, %v1183_v41  ;;  %v1192_v54 = vadd.f32 %v1191_v50, %v1190_v45  ;;  %v2809_v7 = vpop.permute.xlu0 %693  ;;  %v1924_v45 = vsel %vm813_vm0, 1.0, %v2323_v49 }
 0x13a   :  { %v1136_v22 = vsel %vm338_vm11, %v1083_v4, 0.0 }
 0x13b   :  { %v1134_v9 = vrot.slane %v1133_v51, 1  ;;  %v1186_v21 = vrot.slane %v1185_v52, 2  ;;  %v1193_v56 = vrot.slane %v1192_v54, 4  ;;  %v1017_v14 = vpop.permute.xlu1 %1016 }
 0x13c   :  { %v1097_v60 = vmul.f32 %v1936_v55, %v1017_v14 }
 0x13d   :  { %v1135_v18 = vadd.f32 %v1134_v9, %v1133_v51  ;;  %v1187_v62 = vadd.f32 %v1186_v21, %v1185_v52  ;;  %v1194_v63 = vadd.f32 %v1193_v56, %v1192_v54  ;;  %v2815_v1 = vpop.permute.xlu0 %770  ;;  %v1925_v52 = vsel %vm814_vm3, 1.0, %v2323_v49 }
 0x13e   :  { %v1199_v33 = vsel %vm338_vm11, %v1097_v60, 0.0  ;;  %v1939_v60 = vsel %vm828_vm4, 1.0, %v2323_v49 }
 0x13f   :  { %v1270_v57 = vsel %vm421_vm7, %v1135_v18, %v1269_v37  ;;  %v1188_v5 = vrot.slane %v1187_v62, 1  ;;  %v1195_v6 = vrot.slane %v1194_v63, 2  ;;  %v2819_v11 = vpop.permute.xlu1 %700 }
 0x140   :  { %vm817_vm14 = vcmp.eq.s32.totalorder %v2577_v29, %v2819_v11 }
 0x141   :  { %v1196_v44 = vadd.f32 %v1195_v6, %v1194_v63  ;;  %v944_v17 = vpop.permute.xlu0 %943  ;;  %v1189_v10 = vadd.f32 %v1188_v5, %v1187_v62 }
 0x142   :  { %v1084_v27 = vmul.f32 %v1923_v8, %v944_v17 }
 0x143   :  { %v1197_v23 = vrot.slane %v1196_v44, 1  ;;  %v2833_v26 = vpop.permute.xlu1 %777 }
 0x144   :  { %v1137_v28 = vsel %vm338_vm11, %v1084_v27, 0.0  ;;  %vm831_vm3 = vcmp.eq.s32.totalorder %v2577_v29, %v2833_v26 }
 0x145   :  { %v1198_v3 = vadd.f32 %v1197_v23, %v1196_v44  ;;  %v1138_v31 = vadd.f32 %v1137_v28, %v1136_v22  ;;  %v1021_v0 = vpop.permute.xlu0 %1020  ;;  %v1942_v26 = vsel %vm831_vm3, 1.0, %v2323_v49 }
 0x146   :  { %v1098_v13 = vmul.f32 %v1937_v24, %v1021_v0  ;;  %v1365_v0 = vsel %vm509_vm2, %v2547_v59, 0.0 }
 0x147   :  { %v1276_v34 = vsel %vm419_vm6, %v1198_v3, %v1189_v10  ;;  %v1139_v36 = vrot.slane %v1138_v31, 4  ;;  %v951_v37 = vpop.permute.xlu1 %950  ;;  %vm827_vm6 = vcmp.eq.s32.totalorder %v2577_v29, %v2770_v48  ;;  %1366 = vadd.xlane.f32.xlu1 %v1365_v0 }
 0x148   :  { %v1200_v38 = vsel %vm338_vm11, %v1098_v13, 0.0  ;;  %v1085_v25 = vmul.f32 %v1924_v45, %v951_v37  ;;  %v1938_v54 = vsel %vm827_vm6, 1.0, %v2323_v49 }
 0x149   :  { %v1140_v39 = vadd.f32 %v1139_v36, %v1138_v31  ;;  %v1201_v2 = vadd.f32 %v1200_v38, %v1199_v33  ;;  %v2842_v32 = vpop.permute.xlu0 %704  ;;  %v1368_v31 = vsel %vm509_vm2, %v2564_v15, 0.0  ;;  %vm815_vm2 = vcmp.eq.s32.totalorder %v2577_v29, %v2792_v30 }
 0x14a   :  { %v1145_v48 = vsel %vm338_vm11, %v1085_v25, 0.0  ;;  %1369 = vadd.xlane.f32.xlu0 %v1368_v31  ;;  %vm818_vm15 = vcmp.eq.s32.totalorder %v2577_v29, %v2842_v32  ;;  %v1928_v30 = vsel %vm817_vm14, 1.0, %v2323_v49 }
 0x14b   :  { %v1141_v41 = vrot.slane %v1140_v39, 2  ;;  %v1202_v16 = vrot.slane %v1201_v2, 4  ;;  %v1028_v43 = vpop.permute.xlu1 %1027 }
 0x14c   :  { %v1099_v58 = vmul.f32 %v1938_v54, %v1028_v43 }
 0x14d   :  { %v1142_v46 = vadd.f32 %v1141_v41, %v1140_v39  ;;  %v1203_v47 = vadd.f32 %v1202_v16, %v1201_v2  ;;  %v2849_v42 = vpop.permute.xlu0 %781 }
 0x14e   :  { %v1208_v53 = vsel %vm338_vm11, %v1099_v58, 0.0  ;;  %vm832_vm6 = vcmp.eq.s32.totalorder %v2577_v29, %v2849_v42 }
 0x14f   :  { %v1143_v50 = vrot.slane %v1142_v46, 1  ;;  %v1204_v51 = vrot.slane %v1203_v47, 2  ;;  %v2853_v55 = vpop.permute.xlu1 %711 }
 0x151   :  { %v1144_v61 = vadd.f32 %v1143_v50, %v1142_v46  ;;  %v1205_v9 = vadd.f32 %v1204_v51, %v1203_v47  ;;  %v955_v21 = vpop.permute.xlu0 %954 }
 0x152   :  { %v1086_v56 = vmul.f32 %v1925_v52, %v955_v21 }
 0x153   :  { %v1206_v14 = vrot.slane %v1205_v9, 1  ;;  %v2859_v18 = vpop.permute.xlu1 %788  ;;  %v1271_v62 = vsel %vm423_vm8, %v1144_v61, %v1270_v57 }
 0x154   :  { %v1146_v63 = vsel %vm338_vm11, %v1086_v56, 0.0  ;;  %vm833_vm4 = vcmp.eq.s32.totalorder %v2577_v29, %v2859_v18 }
 0x155   :  { %v1207_v4 = vadd.f32 %v1206_v14, %v1205_v9  ;;  %v1147_v5 = vadd.f32 %v1146_v63, %v1145_v48  ;;  %v1032_v6 = vpop.permute.xlu0 %1031 }
 0x156   :  { %v1100_v8 = vmul.f32 %v1939_v60, %v1032_v6 }
 0x157   :  { %v1277_v19 = vsel %vm421_vm7, %v1207_v4, %v1276_v34  ;;  %v1148_v12 = vrot.slane %v1147_v5, 4  ;;  %v962_v10 = vpop.permute.xlu1 %961  ;;  %v1940_v34 = vsel %vm829_vm5, 1.0, %v2323_v49  ;;  %vm830_vm7 = vcmp.eq.s32.totalorder %v2577_v29, %v2815_v1 }
 0x158   :  { %v1209_v44 = vsel %vm338_vm11, %v1100_v8, 0.0  ;;  %v1941_v15 = vsel %vm830_vm7, 1.0, %v2323_v49  ;;  %v1929_v4 = vsel %vm818_vm15, 1.0, %v2323_v49 }
 0x159   :  { %v1149_v17 = vadd.f32 %v1148_v12, %v1147_v5  ;;  %v1210_v22 = vadd.f32 %v1209_v44, %v1208_v53  ;;  %v716_v27 = vpop.permute.xlu0 %715 }
 0x15a   :  { %vm820_vm0 = vcmp.eq.s32.totalorder %v2577_v29, %v716_v27 }
 0x15b   :  { %v1150_v23 = vrot.slane %v1149_v17, 2  ;;  %v1211_v24 = vrot.slane %v1210_v22, 4  ;;  %v1039_v36 = vpop.permute.xlu1 %1038  ;;  %v1931_v11 = vsel %vm820_vm0, 1.0, %v2323_v49  ;;  %vm1766_vm0 = vcmask 516096  }
 0x15c   :  { %v1101_v39 = vmul.f32 %v1940_v34, %v1039_v36 }
 0x15d   :  { %v1151_v57 = vadd.f32 %v1150_v23, %v1149_v17  ;;  %v1212_v28 = vadd.f32 %v1211_v24, %v1210_v22  ;;  %v2868_v3 = vpop.permute.xlu0 %792 }
 0x15e   :  { %v1217_v45 = vsel %vm338_vm11, %v1101_v39, 0.0  ;;  %v513_v39 = vmax.f32 %v2748_v35, 1e-09  ;;  %vm834_vm5 = vcmp.eq.s32.totalorder %v2577_v29, %v2868_v3 }
 0x15f   :  { %v1152_v33 = vrot.slane %v1151_v57, 1  ;;  %v1213_v13 = vrot.slane %v1212_v28, 2  ;;  %v800_v21 = vpop.permute.xlu1 %799  ;;  %v1945_v35 = vsel %vm834_vm5, 1.0, %v2323_v49  ;;  %vm1860_vm5 = vcmp.eq.s32.totalorder %v2577_v29, 2 }
 0x160   :  { %vm835_vm7 = vcmp.eq.s32.totalorder %v2577_v29, %v800_v21  ;;  %2215 = vrcp.f32 %v513_v39 }
 0x161   :  { %v1153_v40 = vadd.f32 %v1152_v33, %v1151_v57  ;;  %v1214_v37 = vadd.f32 %v1213_v13, %v1212_v28  ;;  %v966_v38 = vpop.permute.xlu0 %965 }
 0x163   :  { %v1215_v2 = vrot.slane %v1214_v37, 1  ;;  %v2879_v41 = vsel %vm425_vm9, %v1153_v40, %v1271_v62  ;;  %v973_v56 = vpop.permute.xlu1 %972  ;;  %v1926_v62 = vsel %vm815_vm2, 1.0, %v2323_v49 }
 0x164   :  { %v1087_v32 = vmul.f32 %v1926_v62, %v962_v10  ;;  %v1089_v8 = vmul.f32 %v1928_v30, %v973_v56 }
 0x165   :  { %v1216_v59 = vadd.f32 %v1215_v2, %v1214_v37  ;;  %v1043_v16 = vpop.permute.xlu0 %1042 }
 0x166   :  { %v1102_v43 = vmul.f32 %v1941_v15, %v1043_v16  ;;  %v1154_v44 = vsel %vm338_vm11, %v1087_v32, 0.0  ;;  %v1163_v22 = vsel %vm338_vm11, %v1089_v8, 0.0  ;;  %v1944_v16 = vsel %vm833_vm4, 1.0, %v2323_v49 }
 0x167   :  { %v1278_v46 = vsel %vm423_vm8, %v1216_v59, %v1277_v19  ;;  %v1050_v14 = vpop.permute.xlu1 %1049  ;;  %vm816_vm8 = vcmp.eq.s32.totalorder %v2577_v29, %v2809_v7  ;;  %v1943_v59 = vsel %vm832_vm6, 1.0, %v2323_v49  ;;  %vm1857_vm4 = vcmp.eq.s32.totalorder %v2577_v29, 1 }
 0x168   :  { %v1218_v47 = vsel %vm338_vm11, %v1102_v43, 0.0  ;;  %v1927_v63 = vsel %vm816_vm8, 1.0, %v2323_v49  ;;  %vm522_vm8 = vcmask 523264  }
 0x169   :  { %v1219_v1 = vadd.f32 %v1218_v47, %v1217_v45  ;;  %v804_v48 = vpop.permute.xlu0 %803  ;;  %v1088_v53 = vmul.f32 %v1927_v63, %v966_v38  ;;  %v1946_v45 = vsel %vm835_vm7, 1.0, %v2323_v49  ;;  %v1103_v47 = vmul.f32 %v1942_v26, %v1050_v14  ;;  %v617_v26 = vld [vmem:[%s3202_s9 + $0x50] sm:$0xff] }
 0x16a   :  { %vm836_vm2 = vcmp.eq.s32.totalorder %v2577_v29, %v804_v48  ;;  %vm1863_vm7 = vcmp.eq.s32.totalorder %v2577_v29, 3 }
 0x16b   :  { %v1220_v25 = vrot.slane %v1219_v1, 4  ;;  %v984_v5 = vpop.permute.xlu1 %983  ;;  %v1155_v17 = vsel %vm338_vm11, %v1088_v53, 0.0  ;;  %v1947_v43 = vsel %vm836_vm2, 1.0, %v2323_v49  ;;  %v1226_v48 = vsel %vm338_vm11, %v1103_v47, 0.0  ;;  %v2216_v53 = vpop.eup %2215 }
 0x16c   :  { %v1156_v57 = vadd.f32 %v1155_v17, %v1154_v44  ;;  %vm1866_vm2 = vcmp.eq.s32.totalorder %v2577_v29, 4 }
 0x16d   :  { %v1221_v50 = vadd.f32 %v1220_v25, %v1219_v1  ;;  %v977_v58 = vpop.permute.xlu0 %976 }
 0x16e   :  { %v1157_v31 = vrot.slane %v1156_v57, 4 }
 0x16f   :  { %v1222_v51 = vrot.slane %v1221_v50, 2  ;;  %v1061_v40 = vpop.permute.xlu1 %1060 }
 0x170   :  { %v1158_v13 = vadd.f32 %v1157_v31, %v1156_v57 }
 0x171   :  { %v1223_v52 = vadd.f32 %v1222_v51, %v1221_v50  ;;  %v1054_v60 = vpop.permute.xlu0 %1053  ;;  %v1105_v50 = vmul.f32 %v1944_v16, %v1061_v40 }
 0x172   :  { %v1159_v38 = vrot.slane %v1158_v13, 2  ;;  %v1104_v1 = vmul.f32 %v1943_v59, %v1054_v60  ;;  %v618_v59 = vld [vmem:[%s3202_s9 + $0x58] sm:$0xff] }
 0x173   :  { %v1224_v54 = vrot.slane %v1223_v52, 1  ;;  %v1072_v3 = vpop.permute.xlu1 %1071  ;;  %v1235_v62 = vsel %vm338_vm11, %v1105_v50, 0.0 }
 0x174   :  { %v1160_v42 = vadd.f32 %v1159_v38, %v1158_v13  ;;  %v1227_v56 = vsel %vm338_vm11, %v1104_v1, 0.0 }
 0x175   :  { %v1225_v61 = vadd.f32 %v1224_v54, %v1223_v52  ;;  %v988_v6 = vpop.permute.xlu0 %987  ;;  %v1107_v54 = vmul.f32 %v1946_v45, %v1072_v3 }
 0x176   :  { %v1092_v12 = vmul.f32 %v1931_v11, %v988_v6  ;;  %v1161_v52 = vrot.slane %v1160_v42, 1  ;;  %v610_v11 = vld [vmem:[%s3202_s9 + $0x18] sm:$0xff] }
 0x177   :  { %v2885_v9 = vsel %vm425_vm9, %v1225_v61, %v1278_v46  ;;  %vm819_vm9 = vcmp.eq.s32.totalorder %v2577_v29, %v2853_v55  ;;  %v1090_v55 = vmul.f32 %v1929_v4, %v977_v58  ;;  %v1244_v14 = vsel %vm338_vm11, %v1107_v54, 0.0  ;;  %v621_v54 = vld [vmem:[%s3203_s10 + $0x8] sm:$0xff] }
 0x178   :  { %v1930_v7 = vsel %vm819_vm9, 1.0, %v2323_v49  ;;  %v1173_v24 = vsel %vm338_vm11, %v1092_v12, 0.0  ;;  %v1162_v30 = vadd.f32 %v1161_v52, %v1160_v42  ;;  %v620_v52 = vld [vmem:[%s3203_s10] sm:$0xff] }
 0x179   :  { %v1091_v19 = vmul.f32 %v1930_v7, %v984_v5  ;;  %v1164_v27 = vsel %vm338_vm11, %v1090_v55, 0.0  ;;  %v1065_v37 = vpop.permute.xlu0 %1064  ;;  %v1228_v7 = vadd.f32 %v1227_v56, %v1226_v48  ;;  %v609_v5 = vld [vmem:[%s3202_s9 + $0x10] sm:$0xff]  ;;  %v624_v56 = vld [vmem:[%s3203_s10 + $0x20] sm:$0xff] }
 0x17a   :  { %v1165_v28 = vadd.f32 %v1164_v27, %v1163_v22  ;;  %v1106_v51 = vmul.f32 %v1945_v35, %v1065_v37  ;;  %v1273_v44 = vsel %vm427_vm10, %v1162_v30, %v2879_v41  ;;  %v2136_v17 = vpack.c.bf16 %v610_v11, %v609_v5  ;;  %v616_v37 = vld [vmem:[%s3202_s9 + $0x48] sm:$0xff]  ;;  %v627_v30 = vld [vmem:[%s3203_s10 + $0x38] sm:$0xff] }
 0x17b   :  { %v1172_v23 = vsel %vm338_vm11, %v1091_v19, 0.0  ;;  %v1229_v22 = vrot.slane %v1228_v7, 4  ;;  %v2152_v35 = vpack.c.bf16 %v618_v59, %v617_v26 }
 0x17c   :  { %v1174_v10 = vadd.f32 %v1173_v24, %v1172_v23  ;;  %v1166_v0 = vrot.slane %v1165_v28, 4  ;;  %v1236_v63 = vsel %vm338_vm11, %v1106_v51, 0.0  ;;  %v611_v23 = vld [vmem:[%s3202_s9 + $0x20] sm:$0xff]  ;;  %v612_v24 = vld [vmem:[%s3202_s9 + $0x28] sm:$0xff] }
 0x17d   :  { %v1076_v46 = vpop.permute.xlu0 %1075  ;;  %v1237_v6 = vadd.f32 %v1236_v63, %v1235_v62  ;;  %v2140_v41 = vpack.c.bf16 %v612_v24, %v611_v23  ;;  %v1230_v31 = vadd.f32 %v1229_v22, %v1228_v7  ;;  %v626_v63 = vld [vmem:[%s3203_s10 + $0x30] sm:$0xff]  ;;  %v1487_v22 = vld [vmem:[%s3205_s12] sm:$0xff] }
 0x17e   :  { %v1175_v33 = vrot.slane %v1174_v10, 4  ;;  %v1167_v34 = vadd.f32 %v1166_v0, %v1165_v28  ;;  %v1108_v61 = vmul.f32 %v1947_v43, %v1076_v46  ;;  %v613_v0 = vld [vmem:[%s3202_s9 + $0x30] sm:$0xff]  ;;  %v619_v46 = vld [vmem:[%s3202_s9 + $0x60] sm:$0xf] }
 0x17f   :  { %v1238_v57 = vrot.slane %v1237_v6, 4  ;;  %v1231_v40 = vrot.slane %v1230_v31, 2 }
 0x180   :  { %v1176_v36 = vadd.f32 %v1175_v33, %v1174_v10  ;;  %v1168_v2 = vrot.slane %v1167_v34, 2  ;;  %v1245_v60 = vsel %vm338_vm11, %v1108_v61, 0.0  ;;  %v614_v33 = vld [vmem:[%s3202_s9 + $0x38] sm:$0xff]  ;;  %v2156_v61 = vpack.c.bf16 %v621_v54, %v620_v52 }
 0x181   :  { %v1246_v8 = vadd.f32 %v1245_v60, %v1244_v14  ;;  %v1239_v13 = vadd.f32 %v1238_v57, %v1237_v6  ;;  %v2168_v14 = vpack.c.bf16 %v627_v30, %v626_v63  ;;  %v1914_v60 = vld [vmem:[%s3201_s8] ss:$0 sm:$0xff]  ;;  %v1497_v57 = vld [vmem:[%s3206_s13 + $0x10] sm:$0xff]  ;;  %s1886_s8 = sshll.u32 %s2325_s1, 4  ;;  %s1887_s8 = int_to_ptr.vmem [resolvable:$true] %s1886_s8 }
 0x182   :  { %v1177_v15 = vrot.slane %v1176_v36, 2  ;;  %v1169_v18 = vadd.f32 %v1168_v2, %v1167_v34  ;;  %2157 = vmatprep.subr.bf16.mxu0 %v2156_v61  ;;  %s2295_s16 = scalar_lea.vmem %s1887_s8, 32  ;;  %p2296_p4 = scmp.lt.s32.totalorder %s1887_s8, %s1887_s8 }
 0x183   :  { %v1247_v10 = vrot.slane %v1246_v8, 4  ;;  %v1240_v38 = vrot.slane %v1239_v13, 2  ;;  %2159 = vmatpush3.bf16.msra.mxu0 %v2156_v61 }
 0x184   :  { %v1178_v25 = vadd.f32 %v1177_v15, %v1176_v36  ;;  %v1170_v21 = vrot.slane %v1169_v18, 1  ;;  %v2144_v36 = vpack.c.bf16 %v614_v33, %v613_v0  ;;  %v1232_v15 = vadd.f32 %v1231_v40, %v1230_v31  ;;  %v1500_v40 = vld [vmem:[%s3206_s13 + $0x28] sm:$0xff] }
 0x185   :  { %v1248_v34 = vadd.f32 %v1247_v10, %v1246_v8  ;;  %v1241_v42 = vadd.f32 %v1240_v38, %v1239_v13  ;;  %v1489_v13 = vld [vmem:[%s3205_s12 + $0x10] sm:$0xff]  ;;  %v1491_v38 = vld [vmem:[%s3205_s12 + $0x20] sm:$0xff] }
 0x186   :  { %v1179_v58 = vrot.slane %v1178_v25, 1  ;;  %v1171_v4 = vadd.f32 %v1170_v21, %v1169_v18  ;;  %v1233_v18 = vrot.slane %v1232_v15, 1  ;;  %v623_v21 = vld [vmem:[%s3203_s10 + $0x18] sm:$0xff] }
 0x187   :  { %v1249_v39 = vrot.slane %v1248_v34, 2  ;;  %v1242_v45 = vrot.slane %v1241_v42, 1 }
 0x188   :  { %v1180_v32 = vadd.f32 %v1179_v58, %v1178_v25  ;;  %v1274_v27 = vsel %vm429_vm12, %v1171_v4, %v1273_v44  ;;  %v1234_v43 = vadd.f32 %v1233_v18, %v1232_v15  ;;  %v625_v58 = vld [vmem:[%s3203_s10 + $0x28] sm:$0xff]  ;;  %v1502_v15 = vld [vmem:[%s3206_s13 + $0x38] sm:$0xff] }
 0x189   :  { %v1250_v16 = vadd.f32 %v1249_v39, %v1248_v34  ;;  %v1243_v47 = vadd.f32 %v1242_v45, %v1241_v42  ;;  %v2164_v62 = vpack.c.bf16 %v625_v58, %v624_v56  ;;  %v1490_v34 = vld [vmem:[%s3205_s12 + $0x18] sm:$0xff]  ;;  %v1492_v39 = vld [vmem:[%s3205_s12 + $0x28] sm:$0xff]  ;;  %v1493_v42 = vld [vmem:[%s3205_s12 + $0x30] sm:$0xff] }
 0x18a   :  { %v1275_v28 = vsel %vm431_vm13, %v1180_v32, %v1274_v27  ;;  %v1280_v25 = vsel %vm427_vm10, %v1234_v43, %v2885_v9  ;;  %v622_v9 = vld [vmem:[%s3203_s10 + $0x10] sm:$0xff]  ;;  %v1488_v27 = vld [vmem:[%s3205_s12 + $0x8] sm:$0xff]  ;;  %v2182_v26 = vpack.c.bf16 %v1492_v39, %v1491_v38  ;;  %vm1604_vm10 = vcmask 7168  }
 0x18b   :  { %v1251_v3 = vrot.slane %v1250_v16, 1  ;;  %v1281_v50 = vsel %vm429_vm12, %v1243_v47, %v1280_v25  ;;  %v2160_v48 = vpack.c.bf16 %v623_v21, %v622_v9  ;;  %v2174_v31 = vpack.c.bf16 %v1488_v27, %v1487_v22  ;;  %v1951_v47 = vld [vmem:[%s3204_s11] ss:$0 sm:$0xff] }
 0x18d   :  { %v1252_v1 = vadd.f32 %v1251_v3, %v1250_v16  ;;  %2161 = vmatprep.subr.bf16.mxu0 %v2160_v48  ;;  %v1494_v16 = vld [vmem:[%s3205_s12 + $0x38] sm:$0xff] }
 0x18e   :  { %2163 = vmatpush3.bf16.msra.mxu0 %v2160_v48 }
 0x18f   :  { %v1282_v51 = vsel %vm431_vm13, %v1252_v1, %v1281_v50  ;;  %2165 = vmatprep.subr.bf16.mxu0 %v2164_v62 }
 0x192   :  { %2167 = vmatpush3.bf16.msra.mxu0 %v2164_v62 }
 0x193   :  { %2169 = vmatprep.subr.bf16.mxu0 %v2168_v14 }
 0x196   :  { %2171 = vmatpush3.bf16.msra.mxu0 %v2168_v14 }
 0x1c1   :  { %v505_v55 = vpop.f32.mrb[0].mxu0 }
 0x1c2   :  { %v515_v19 = vmul.f32 %v2216_v53, %v505_v55  ;;  %v2034_v12 = vpop.f32.mrb[1].mxu0 }
 0x1c3   :  { %v1496_v12 = vld [vmem:[%s3206_s13 + $0x8] sm:$0xff] }
 0x1c4   :  { %2052 = vmatmul.mubr.msk.f32.vlgmr.msra.gmra.mrb[0].mxu1 %vm522_vm8, %v515_v19  ;;  %v1495_v19 = vld [vmem:[%s3206_s13] sm:$0xff] }
 0x1c5   :  { %2135 = vmatpush3.bf16.msra.mxu1 %v2829_v20  ;;  %2080 = vmatprep.mubr.msk.f32.mxu1 %vm338_vm11, %v1275_v28  ;;  %v615_v20 = vld [vmem:[%s3202_s9 + $0x40] sm:$0xff]  ;;  %v2172_v44 = vpack.c.bf16 %v1496_v12, %v1495_v19  ;;  %v1498_v28 = vld [vmem:[%s3206_s13 + $0x18] sm:$0xff] }
 0x1c6   :  { %2137 = vmatprep.subr.bf16.mxu1 %v2136_v17  ;;  %v2148_v2 = vpack.c.bf16 %v616_v37, %v615_v20  ;;  %v2176_v33 = vpack.c.bf16 %v1498_v28, %v1497_v57  ;;  %v2178_v20 = vpack.c.bf16 %v1490_v34, %v1489_v13 }
 0x1c7   :  { %2173 = vmatprep.subr.bf16.mxu0 %v2172_v44 }
 0x1c9   :  { %2139 = vmatpush3.bf16.msra.mxu1 %v2136_v17 }
 0x1ca   :  { %2141 = vmatprep.subr.bf16.mxu1 %v2140_v41 }
 0x1cd   :  { %2143 = vmatpush3.bf16.msra.mxu1 %v2140_v41 }
 0x1ce   :  { %2145 = vmatprep.subr.bf16.mxu1 %v2144_v36 }
 0x1d1   :  { %2147 = vmatpush3.bf16.msra.mxu1 %v2144_v36  ;;  %v1499_v36 = vld [vmem:[%s3206_s13 + $0x20] sm:$0xff] }
 0x1d2   :  { %2149 = vmatprep.subr.bf16.mxu1 %v2148_v2  ;;  %v2180_v37 = vpack.c.bf16 %v1500_v40, %v1499_v36 }
 0x1d4   :  { %v1367_v32 = vpop.xlane.xlu1 %1366 }
 0x1d5   :  { %2151 = vmatpush3.bf16.msra.mxu1 %v2148_v2  ;;  %v1371_v8 = vmax.f32 %v1367_v32, 1e-09  ;;  %v1501_v2 = vld [vmem:[%s3206_s13 + $0x30] sm:$0xff]  ;;  %s2291_s13 = scalar_lea.vmem %s1887_s8, 16 }
 0x1d6   :  { %2153 = vmatprep.subr.bf16.mxu1 %v2152_v35  ;;  %v2184_v59 = vpack.c.bf16 %v1502_v15, %v1501_v2  ;;  %p2292_p3 = scmp.ne.s32.totalorder %s1887_s8, %s2291_s13  ;;  %p2297_p5 = scmp.lt.s32.totalorder %s2295_s16, %s2291_s13 }
 0x1d7   :  { %v1370_v53 = vpop.xlane.xlu0 %1369  ;;  %2217 = vrcp.f32 %v1371_v8 }
 0x1d8   :  { %v1372_v55 = vmax.f32 %v1370_v53, 1e-09  ;;  %p2298_p6 = por %p2297_p5, %p2296_p4 }
 0x1d9   :  { %2155 = vmatpush3.bf16.msra.mxu1 %v2152_v35  ;;  %v2186_v35 = vpack.c.bf16 %v1494_v16, %v1493_v42 }
 0x1da   :  { %2078 = vmatprep.subr.msk.mxu1 %vm435_vm1, %v619_v46  ;;  %2219 = vrcp.f32 %v1372_v55  ;;  %p2299_p7 = pnand %p2298_p6, %p2292_p3 }
 0x1dd   :  { %2079 = vmatpush3.msk.msra.mxu1 %vm435_vm1, %v619_v46 }
 0x1de   :  { %2081 = vmatmul.mubr.msk.f32.vlgmr.msra.gmra.mrb[2].mxu1 %vm338_vm11, %v1282_v51 }
 0x1e1   :  { %v2218_v17 = vpop.eup %2217 }
 0x1e4   :  { %v2220_v23 = vpop.eup %2219 }
 0x297   :  { %v592_v4 = vpop.f32.mrb[0].mxu1 }
 0x298   :  { %v593_v7 = vadd.f32 %v1914_v60, %v592_v4  ;;  %v2053_v5 = vpop.f32.mrb[1].mxu1 }
 0x29a   :  { %v596_v11 = vmul.f32 %v593_v7, %v593_v7 }
 0x29c   :  { %v597_v6 = vsel %vm522_vm8, %v596_v11, 0.0 }
 0x29d   :  { %598 = vadd.xlane.f32.xlu0 %v597_v6 }
 0x2b1   :  { %v2082_v24 = vpop.f32.mrb[2].mxu1 }
 0x2b2   :  { %v1356_v10 = vpop.f32.mrb[3].mxu1  ;;  %v1376_v0 = vmul.f32 %v2220_v23, %v2082_v24 }
 0x2b3   :  { %v1375_v41 = vmul.f32 %v2218_v17, %v1356_v10 }
 0x2b5   :  { %2099 = vmatprep.mubr.msk.f32.mxu0 %vm522_vm8, %v1375_v41 }
 0x2b6   :  { %2100 = vmatmul.mubr.msk.f32.vlgmr.msra.gmra.mrb[2].mxu0 %vm522_vm8, %v1376_v0 }
 0x2b7   :  { %2175 = vmatpush1.bf16.msra.mxu0 %v2174_v31  ;;  %1570 = vmatprep.mubr.f32.mxu0 %v2323_v49 }
 0x2b8   :  { %2177 = vmatprep.subr.bf16.mxu0 %v2176_v33 }
 0x2bb   :  { %2179 = vmatpush1.bf16.msra.mxu0 %v2178_v20 }
 0x2bc   :  { %2181 = vmatprep.subr.bf16.mxu0 %v2180_v37 }
 0x2bf   :  { %2183 = vmatpush1.bf16.msra.mxu0 %v2182_v26 }
 0x2c0   :  { %2185 = vmatprep.subr.bf16.mxu0 %v2184_v59 }
 0x2c3   :  { %2187 = vmatpush1.bf16.msra.mxu0 %v2186_v35 }
 0x32a   :  { %v599_v18 = vpop.xlane.xlu0 %598 }
 0x32b   :  { %v600_v45 = vmax.f32 %v599_v18, 1e-24 }
 0x32d   :  { %2221 = vrsqrt.f32 %v600_v45 }
 0x337   :  { %v2222_v3 = vpop.eup %2221 }
 0x338   :  { %v3059_v43 = vmul.f32 %v2222_v3, %v593_v7 }
 0x33a   :  { %v1478_v46 = vmul.f32 20.0, %v3059_v43  ;;  %v1739_v13 = vsel %vm522_vm8, %v3059_v43, 0.0 }
 0x33b   :  { %v1740_v40 = vrot.slane %v1739_v13, 4 }
 0x33c   :  { %1954 = vmatmul.mubr.msk.f32.vlgmr.msra.gmra.mrb[4].mxu0 %vm522_vm8, %v1478_v46 }
 0x33d   :  { %v1741_v38 = vadd.f32 %v1740_v40, %v1739_v13 }
 0x33f   :  { %v1742_v15 = vrot.slane %v1741_v38, 2 }
 0x341   :  { %v1743_v42 = vadd.f32 %v1742_v15, %v1741_v38 }
 0x343   :  { %v1744_v18 = vrot.slane %v1743_v42, 1 }
 0x389   :  { %v2101_v1 = vpop.f32.mrb[2].mxu0 }
 0x38a   :  { %v1461_v25 = vadd.f32 %v2101_v1, %v1951_v47  ;;  %v1455_v50 = vpop.f32.mrb[3].mxu0 }
 0x38b   :  { %v1456_v51 = vadd.f32 %v1951_v47, %v1455_v50 }
 0x38c   :  { %v1465_v52 = vmul.f32 %v1461_v25, %v1461_v25 }
 0x38d   :  { %v1464_v54 = vmul.f32 %v1456_v51, %v1456_v51 }
 0x38e   :  { %v1469_v9 = vsel %vm522_vm8, %v1465_v52, 0.0 }
 0x38f   :  { %1470 = vadd.xlane.f32.xlu1 %v1469_v9  ;;  %v1466_v61 = vsel %vm522_vm8, %v1464_v54, 0.0 }
 0x390   :  { %1467 = vadd.xlane.f32.xlu0 %v1466_v61 }
 0x40f   :  { %v1572_v21 = vpop.f32.mrb[4].mxu0 }
 0x410   :  { %v1574_v48 = vpop.f32.mrb[5].mxu0  ;;  %v1717_v56 = vmul.f32 0.8, %v1572_v21 }
 0x411   :  { %v1718_v58 = vmul.f32 0.2, %v1574_v48  ;;  %v1661_v62 = vsub.f32 %v1572_v21, %v1574_v48 }
 0x413   :  { %v1719_v63 = vadd.f32 %v1718_v58, %v1717_v56  ;;  %v1662_v31 = vsub.f32 2.0, %v1661_v62 }
 0x415   :  { %v1663_v0 = vmax.f32 %v1662_v31, 0.0 }
 0x41c   :  { %v1471_v30 = vpop.xlane.xlu1 %1470 }
 0x41d   :  { %v1473_v14 = vmax.f32 %v1471_v30, 1e-24  ;;  %v1468_v60 = vpop.xlane.xlu0 %1467 }
 0x41e   :  { %v1472_v4 = vmax.f32 %v1468_v60, 1e-24 }
 0x41f   :  { %2223 = vrsqrt.f32 %v1473_v14 }
 0x420   :  { %2225 = vrsqrt.f32 %v1472_v4 }
 0x429   :  { %v2224_v7 = vpop.eup %2223 }
 0x42a   :  { %v2226_v5 = vpop.eup %2225  ;;  %v1477_v11 = vmul.f32 %v2224_v7, %v1461_v25 }
 0x42b   :  { %v1476_v6 = vmul.f32 %v2226_v5, %v1456_v51 }
 0x42c   :  { %v1483_v32 = vmul.f32 %v1478_v46, %v1477_v11  ;;  %v1818_v36 = vsel %vm522_vm8, %v1477_v11, 0.0 }
 0x42d   :  { %v1479_v53 = vmul.f32 %v1478_v46, %v1476_v6  ;;  %v1780_v33 = vsel %vm522_vm8, %v1476_v6, 0.0  ;;  %v1819_v20 = vrot.slane %v1818_v36, 4  ;;  %v1745_v46 = vadd.f32 %v1744_v18, %v1743_v42 }
 0x42e   :  { %v1484_v8 = vsel %vm522_vm8, %v1483_v32, 0.0  ;;  %v1781_v34 = vrot.slane %v1780_v33, 4 }
 0x42f   :  { %1485 = vadd.xlane.f32.xlu1 %v1484_v8  ;;  %v1480_v55 = vsel %vm522_vm8, %v1479_v53, 0.0  ;;  %v1820_v39 = vadd.f32 %v1819_v20, %v1818_v36  ;;  %v1747_v25 = vmul.f32 0.125, %v1745_v46 }
 0x430   :  { %1481 = vadd.xlane.f32.xlu0 %v1480_v55  ;;  %v1782_v37 = vadd.f32 %v1781_v34, %v1780_v33 }
 0x431   :  { %v1821_v26 = vrot.slane %v1820_v39, 2  ;;  %v1748_v52 = vsub.f32 %v3059_v43, %v1747_v25 }
 0x432   :  { %v1783_v2 = vrot.slane %v1782_v37, 2 }
 0x433   :  { %1618 = vmax.xlane.f32.xlu1 %v1574_v48  ;;  %v1822_v16 = vadd.f32 %v1821_v26, %v1820_v39  ;;  %v1749_v61 = vmul.f32 %v1748_v52, %v1748_v52 }
 0x434   :  { %1577 = vmax.xlane.f32.xlu0 %v1572_v21  ;;  %v1784_v59 = vadd.f32 %v1783_v2, %v1782_v37 }
 0x435   :  { %v1823_v45 = vrot.slane %v1822_v16, 1  ;;  %v1750_v62 = vsel %vm522_vm8, %v1749_v61, 0.0 }
 0x436   :  { %v1785_v35 = vrot.slane %v1784_v59, 1  ;;  %v1751_v43 = vrot.slane %v1750_v62, 4 }
 0x437   :  { %v1824_v47 = vadd.f32 %v1823_v45, %v1822_v16 }
 0x438   :  { %v1786_v3 = vadd.f32 %v1785_v35, %v1784_v59  ;;  %v1752_v5 = vadd.f32 %v1751_v43, %v1750_v62 }
 0x439   :  { %v1825_v50 = vmul.f32 0.125, %v1824_v47 }
 0x43a   :  { %v1787_v1 = vmul.f32 0.125, %v1786_v3  ;;  %v1753_v32 = vrot.slane %v1752_v5, 2 }
 0x43b   :  { %v1826_v54 = vsub.f32 %v1477_v11, %v1825_v50 }
 0x43c   :  { %v1788_v51 = vsub.f32 %v1476_v6, %v1787_v1 }
 0x43e   :  { %v1789_v9 = vmul.f32 %v1788_v51, %v1788_v51 }
 0x440   :  { %v1790_v56 = vsel %vm522_vm8, %v1789_v9, 0.0 }
 0x441   :  { %v1791_v30 = vrot.slane %v1790_v56, 4 }
 0x443   :  { %v1792_v7 = vadd.f32 %v1791_v30, %v1790_v56 }
 0x445   :  { %v1793_v6 = vrot.slane %v1792_v7, 2 }
 0x447   :  { %v1794_v8 = vadd.f32 %v1793_v6, %v1792_v7 }
 0x449   :  { %v1795_v31 = vrot.slane %v1794_v8, 1 }
 0x44b   :  { %v1796_v34 = vadd.f32 %v1795_v31, %v1794_v8 }
 0x44d   :  { %v3100_v20 = vmul.f32 0.14285715, %v1796_v34 }
 0x44f   :  { %vm1800_vm13 = vcmp.eq.f32.partialorder %v3100_v20, inf  ;;  %vm1802_vm15 = vcmp.eq.f32.partialorder %v3100_v20, 0.0 }
 0x4bc   :  { %v3070_v19 = vpop.xlane.xlu1 %1485 }
 0x4bd   :  { %v3072_v12 = vpop.xlane.xlu0 %1481 }
 0x4be   :  { %v1658_v37 = vsub.f32 %v3072_v12, %v3070_v19 }
 0x4c0   :  { %v3074_v44 = vpop.xlane.xlu1 %1618  ;;  %v1659_v16 = vsub.f32 2.0, %v1658_v37 }
 0x4c1   :  { %v3078_v17 = vmax.f32 %v3070_v19, %v3074_v44  ;;  %v3080_v22 = vpop.xlane.xlu0 %1577  ;;  %vm1642_vm1 = vcmp.ge.f32.partialorder %v3070_v19, %v3074_v44 }
 0x4c2   :  { %v3084_v27 = vmax.f32 %v3072_v12, %v3080_v22  ;;  %vm1601_vm11 = vcmp.ge.f32.partialorder %v3072_v12, %v3080_v22  ;;  %v1660_v1 = vmax.f32 %v1659_v16, 0.0  ;;  %v1956_v22 = vsel %vm1642_vm1, 1.0, %v2323_v49 }
 0x4c3   :  { %v1624_v23 = vsub.f32 %v1574_v48, %v3078_v17  ;;  %v1955_v52 = vsel %vm1601_vm11, 1.0, %v2323_v49  ;;  %vm1872_vm1 = vcmp.eq.s32.totalorder %v2577_v29, 6  ;;  %vm1875_vm11 = vcmp.eq.s32.totalorder %v2577_v29, 7 }
 0x4c4   :  { %v1583_v24 = vsub.f32 %v1572_v21, %v3084_v27  ;;  %v1580_v58 = vsub.f32 %v3072_v12, %v3084_v27  ;;  %v1667_v56 = vmul.f32 %v1956_v22, %v1955_v52 }
 0x4c5   :  { %v1625_v57 = vmul.f32 1.442695, %v1624_v23 }
 0x4c6   :  { %v1584_v28 = vmul.f32 1.442695, %v1583_v24  ;;  %v1581_v60 = vmul.f32 1.442695, %v1580_v58  ;;  %v1754_v24 = vadd.f32 %v1753_v32, %v1752_v5  ;;  %v1668_v8 = vsel %vm1604_vm10, %v1667_v56, 0.0 }
 0x4c7   :  { %2227 = vpow2.f32 %v1625_v57 }
 0x4c8   :  { %2229 = vpow2.f32 %v1584_v28  ;;  %v1755_v33 = vrot.slane %v1754_v24, 1 }
 0x4ca   :  { %v1756_v36 = vadd.f32 %v1755_v33, %v1754_v24 }
 0x4cc   :  { %v3104_v2 = vmul.f32 0.14285715, %v1756_v36 }
 0x4ce   :  { %vm1761_vm14 = vcmp.eq.f32.partialorder %v3104_v2, inf  ;;  %vm1763_vm9 = vcmp.eq.f32.partialorder %v3104_v2, 0.0 }
 0x4d1   :  { %v2228_v10 = vpop.eup %2227 }
 0x4d2   :  { %1627 = vadd.xlane.f32.xlu1 %v2228_v10  ;;  %v2230_v41 = vpop.eup %2229 }
 0x4d3   :  { %1586 = vadd.xlane.f32.xlu0 %v2230_v41 }
 0x4d6   :  { %1635 = vadd.xlane.f32.xlu1 %v1574_v48  ;;  %v1827_v48 = vmul.f32 %v1826_v54, %v1826_v54  ;;  %v1714_v54 = vmul.f32 0.8, %v3072_v12 }
 0x4d7   :  { %1594 = vadd.xlane.f32.xlu0 %v1572_v21  ;;  %v1621_v21 = vsub.f32 %v3070_v19, %v3078_v17 }
 0x4d8   :  { %v1828_v14 = vsel %vm522_vm8, %v1827_v48, 0.0  ;;  %vm1869_vm8 = vcmp.eq.s32.totalorder %v2577_v29, 5 }
 0x4d9   :  { %v1829_v4 = vrot.slane %v1828_v14, 4 }
 0x4da   :  { %1720 = vmax.xlane.f32.xlu1 %v1719_v63  ;;  %v1622_v63 = vmul.f32 1.442695, %v1621_v21 }
 0x4db   :  { %1664 = vadd.xlane.f32.xlu0 %v1663_v0  ;;  %v1830_v11 = vadd.f32 %v1829_v4, %v1828_v14 }
 0x4dc   :  { %2231 = vpow2.f32 %v1622_v63 }
 0x4dd   :  { %2233 = vpow2.f32 %v1581_v60  ;;  %v1831_v53 = vrot.slane %v1830_v11, 2 }
 0x4df   :  { %v1832_v41 = vadd.f32 %v1831_v53, %v1830_v11 }
 0x4e1   :  { %v1833_v13 = vrot.slane %v1832_v41, 1 }
 0x4e3   :  { %v1834_v40 = vadd.f32 %v1833_v13, %v1832_v41 }
 0x4e5   :  { %v3106_v59 = vmul.f32 0.14285715, %v1834_v40 }
 0x4e6   :  { %v2232_v55 = vpop.eup %2231 }
 0x4e7   :  { %v2234_v28 = vpop.eup %2233  ;;  %vm1838_vm3 = vcmp.eq.f32.partialorder %v3106_v59, inf  ;;  %v1841_v13 = vand.u32 2147483648, %v3106_v59  ;;  %vm1840_vm6 = vcmp.eq.f32.partialorder %v3106_v59, 0.0 }
 0x55f   :  { %v1628_v23 = vpop.xlane.xlu1 %1627 }
 0x560   :  { %v1629_v57 = vadd.f32 %v2232_v55, %v1628_v23  ;;  %v1587_v10 = vpop.xlane.xlu0 %1586  ;;  %v1803_v23 = vand.u32 2147483648, %v3100_v20 }
 0x561   :  { %v1588_v0 = vadd.f32 %v2234_v28, %v1587_v10  ;;  %v1764_v10 = vand.u32 2147483648, %v3104_v2 }
 0x562   :  { %2235 = vlog2.f32 %v1629_v57 }
 0x563   :  { %2237 = vlog2.f32 %v1588_v0  ;;  %v1636_v42 = vpop.xlane.xlu1 %1635 }
 0x564   :  { %v1595_v39 = vpop.xlane.xlu0 %1594  ;;  %2239 = vrsqrt.f32 %v3100_v20  ;;  %v1637_v46 = vadd.f32 %v1636_v42, %v3070_v19 }
 0x565   :  { %2241 = vrsqrt.f32 %v3104_v2  ;;  %v1596_v44 = vadd.f32 %v1595_v39, %v3072_v12 }
 0x566   :  { %2243 = vrsqrt.f32 %v3106_v59 }
 0x567   :  { %v1721_v14 = vpop.xlane.xlu1 %1720 }
 0x568   :  { %v1665_v25 = vpop.xlane.xlu0 %1664 }
 0x569   :  { %v1666_v21 = vadd.f32 %v1665_v25, %v1660_v1 }
 0x56b   :  { %v1678_v43 = vmul.f32 %v1667_v56, %v1666_v21  ;;  %v1695_v41 = vsel %vm1604_vm10, %v1666_v21, 0.0 }
 0x56c   :  { %v2236_v38 = vpop.eup %2235 }
 0x56d   :  { %v1631_v15 = vmul.f32 0.6931472, %v2236_v38  ;;  %v2238_v26 = vpop.eup %2237  ;;  %v1679_v6 = vsel %vm1604_vm10, %v1678_v43, 0.0 }
 0x56e   :  { %v1590_v18 = vmul.f32 0.6931472, %v2238_v26  ;;  %v2240_v30 = vpop.eup %2239 }
 0x56f   :  { %v1632_v35 = vadd.f32 %v1631_v15, %v3078_v17  ;;  %v2242_v5 = vpop.eup %2241 }
 0x570   :  { %v1591_v45 = vadd.f32 %v1590_v18, %v3084_v27  ;;  %v1715_v27 = vmul.f32 0.2, %v3070_v19  ;;  %v2244_v11 = vpop.eup %2243  ;;  %v1760_v32 = vmul.f32 %v2242_v5, %v3104_v2 }
 0x571   :  { %v1634_v3 = vmul.f32 129.0, %v1632_v35  ;;  %v1633_v47 = vsub.f32 %v1632_v35, %v3070_v19 }
 0x572   :  { %v1593_v50 = vmul.f32 129.0, %v1591_v45  ;;  %v1592_v51 = vsub.f32 %v1591_v45, %v3072_v12  ;;  %v1716_v60 = vadd.f32 %v1715_v27, %v1714_v54  ;;  %v1799_v12 = vmul.f32 %v2240_v30, %v3100_v20 }
 0x573   :  { %v1638_v17 = vsub.f32 %v1634_v3, %v1637_v46  ;;  %v1639_v48 = vmul.f32 0.9, %v1633_v47  ;;  %v1762_v57 = vsel %vm1761_vm14, %v3104_v2, %v1760_v32 }
 0x574   :  { %v1597_v61 = vsub.f32 %v1593_v50, %v1596_v44  ;;  %v1598_v63 = vmul.f32 0.9, %v1592_v51  ;;  %vm1722_vm12 = vcmp.ge.f32.partialorder %v1716_v60, %v1721_v14  ;;  %v1801_v55 = vsel %vm1800_vm13, %v3100_v20, %v1799_v12 }
 0x575   :  { %v1640_v9 = vmul.f32 0.0007751938, %v1638_v17  ;;  %v1957_v53 = vsel %vm1722_vm12, 1.0, %v2323_v49  ;;  %v1837_v49 = vmul.f32 %v2244_v11, %v3106_v59  ;;  %v1804_v28 = vsel %vm1802_vm15, %v1803_v23, %v1801_v55 }
 0x576   :  { %v1599_v58 = vmul.f32 0.0007751938, %v1597_v61  ;;  %v1725_v24 = vsel %vm1604_vm10, %v1957_v53, 0.0  ;;  %v1765_v31 = vsel %vm1763_vm9, %v1764_v10, %v1762_v57  ;;  %v1805_v0 = vsel %vm1766_vm0, %v1804_v28, 0.0 }
 0x577   :  { %v1641_v62 = vadd.f32 %v1640_v9, %v1639_v48  ;;  %v1839_v33 = vsel %vm1838_vm3, %v3106_v59, %v1837_v49  ;;  %v1767_v34 = vsel %vm1766_vm0, %v1765_v31, 0.0 }
 0x578   :  { %v1600_v7 = vadd.f32 %v1599_v58, %v1598_v63  ;;  %v1842_v36 = vsel %vm1840_vm6, %v1841_v13, %v1839_v33 }
 0x579   :  { %v1645_v4 = vsel %vm1604_vm10, %v1641_v62, 0.0  ;;  %v1843_v40 = vsel %vm1766_vm0, %v1842_v36, 0.0 }
 0x57a   :  { %1646 = vadd.xlane.f32.xlu1 %v1645_v4  ;;  %v1605_v19 = vsel %vm1604_vm10, %v1600_v7, 0.0  ;;  %vm1878_vm10 = vcmask 57344  }
 0x57b   :  { %1606 = vadd.xlane.f32.xlu0 %v1605_v19 }
 0x57e   :  { %1680 = vadd.xlane.f32.xlu1 %v1679_v6 }
 0x57f   :  { %1669 = vadd.xlane.f32.xlu0 %v1668_v8 }
 0x582   :  { %1726 = vadd.xlane.f32.xlu1 %v1725_v24 }
 0x583   :  { %1696 = vadd.xlane.f32.xlu0 %v1695_v41 }
 0x586   :  { %1806 = vadd.xlane.f32.xlu1 %v1805_v0 }
 0x587   :  { %1768 = vadd.xlane.f32.xlu0 %v1767_v34 }
 0x58b   :  { %1844 = vadd.xlane.f32.xlu0 %v1843_v40 }
 0x607   :  { %v1647_v20 = vpop.xlane.xlu1 %1646 }
 0x608   :  { %v1648_v37 = vrot.slane %v1647_v20, 4  ;;  %v1607_v38 = vpop.xlane.xlu0 %1606 }
 0x609   :  { %v1608_v2 = vrot.slane %v1607_v38, 4 }
 0x60a   :  { %v1649_v39 = vadd.f32 %v1648_v37, %v1647_v20 }
 0x60b   :  { %v1681_v15 = vpop.xlane.xlu1 %1680  ;;  %v1609_v42 = vadd.f32 %v1608_v2, %v1607_v38 }
 0x60c   :  { %v1650_v26 = vrot.slane %v1649_v39, 2  ;;  %v1682_v16 = vrot.slane %v1681_v15, 4  ;;  %v1670_v35 = vpop.xlane.xlu0 %1669 }
 0x60d   :  { %v1610_v18 = vrot.slane %v1609_v42, 2  ;;  %v1671_v3 = vrot.slane %v1670_v35, 4 }
 0x60e   :  { %v1683_v45 = vadd.f32 %v1682_v16, %v1681_v15  ;;  %v1651_v46 = vadd.f32 %v1650_v26, %v1649_v39 }
 0x60f   :  { %v1672_v59 = vadd.f32 %v1671_v3, %v1670_v35  ;;  %v1611_v1 = vadd.f32 %v1610_v18, %v1609_v42  ;;  %v1727_v48 = vpop.xlane.xlu1 %1726 }
 0x610   :  { %v1684_v47 = vrot.slane %v1683_v45, 2  ;;  %v1652_v25 = vrot.slane %v1651_v46, 1  ;;  %v1697_v21 = vpop.xlane.xlu0 %1696  ;;  %v1728_v63 = vrot.slane %v1727_v48, 4 }
 0x611   :  { %v1673_v17 = vrot.slane %v1672_v59, 2  ;;  %v1612_v50 = vrot.slane %v1611_v1, 1  ;;  %v1698_v58 = vrot.slane %v1697_v21, 4 }
 0x612   :  { %v1653_v44 = vadd.f32 %v1652_v25, %v1651_v46  ;;  %v1685_v51 = vadd.f32 %v1684_v47, %v1683_v45  ;;  %v1729_v7 = vadd.f32 %v1728_v63, %v1727_v48 }
 0x613   :  { %v1613_v22 = vadd.f32 %v1612_v50, %v1611_v1  ;;  %v1674_v52 = vadd.f32 %v1673_v17, %v1672_v59  ;;  %v1807_v62 = vpop.xlane.xlu1 %1806  ;;  %v1699_v43 = vadd.f32 %v1698_v58, %v1697_v21 }
 0x614   :  { %v1686_v27 = vrot.slane %v1685_v51, 1  ;;  %v1769_v56 = vpop.xlane.xlu0 %1768  ;;  %v1808_v60 = vrot.slane %v1807_v62, 4  ;;  %v1730_v6 = vrot.slane %v1729_v7, 2 }
 0x615   :  { %2188 = vpush %v1613_v22  ;;  %v1675_v54 = vrot.slane %v1674_v52, 1  ;;  %v1770_v14 = vrot.slane %v1769_v56, 4  ;;  %v1700_v12 = vrot.slane %v1699_v43, 2 }
 0x616   :  { %2190 = vpush %v1653_v44  ;;  %v1687_v9 = vadd.f32 %v1686_v27, %v1685_v51  ;;  %v1809_v19 = vadd.f32 %v1808_v60, %v1807_v62  ;;  %v1731_v24 = vadd.f32 %v1730_v6, %v1729_v7 }
 0x617   :  { %v1676_v61 = vadd.f32 %v1675_v54, %v1674_v52  ;;  %v1771_v5 = vadd.f32 %v1770_v14, %v1769_v56  ;;  %v1701_v23 = vadd.f32 %v1700_v12, %v1699_v43 }
 0x618   :  { %v1845_v30 = vpop.xlane.xlu0 %1844  ;;  %v1810_v8 = vrot.slane %v1809_v19, 2  ;;  %v1732_v41 = vrot.slane %v1731_v24, 1 }
 0x619   :  { %2192 = vpush %v1676_v61  ;;  %v1846_v4 = vrot.slane %v1845_v30, 4  ;;  %v1772_v53 = vrot.slane %v1771_v5, 2  ;;  %v1702_v10 = vrot.slane %v1701_v23, 1 }
 0x61a   :  { %2194 = vpush %v1687_v9  ;;  %v1811_v49 = vadd.f32 %v1810_v8, %v1809_v19  ;;  %v1733_v36 = vadd.f32 %v1732_v41, %v1731_v24 }
 0x61b   :  { %v1847_v11 = vadd.f32 %v1846_v4, %v1845_v30  ;;  %v1773_v57 = vadd.f32 %v1772_v53, %v1771_v5  ;;  %v1703_v13 = vadd.f32 %v1702_v10, %v1701_v23 }
 0x61c   :  { %v1812_v0 = vrot.slane %v1811_v49, 1 }
 0x61d   :  { %v1848_v55 = vrot.slane %v1847_v11, 2  ;;  %v1774_v31 = vrot.slane %v1773_v57, 1 }
 0x61e   :  { %v1813_v20 = vadd.f32 %v1812_v0, %v1811_v49 }
 0x61f   :  { %v1849_v28 = vadd.f32 %v1848_v55, %v1847_v11  ;;  %v1775_v40 = vadd.f32 %v1774_v31, %v1773_v57 }
 0x621   :  { %v1850_v34 = vrot.slane %v1849_v28, 1 }
 0x623   :  { %v1851_v37 = vadd.f32 %v1850_v34, %v1849_v28 }
 0x646   :  { %s3147_s11 = spop %2188 }
 0x647   :  { %s1617_s12 = smul.f32 0.125, %s3147_s11  ;;  %s3150_s23 = spop %2190 }
 0x648   :  { %s1657_s7 = smul.f32 0.125, %s3150_s23 }
 0x649   :  { %s3155_s24 = smul.f32 0.8, %s1617_s12  ;;  %v1858_v38 = vstv %s1617_s12 }
 0x64a   :  { %s3159_s25 = smul.f32 0.2, %s1657_s7  ;;  %s3161_s26 = spop %2192  ;;  %v1861_v2 = vstv %s1657_s7 }
 0x64b   :  { %s1689_s27 = smax.f32 %s2324_s6, %s3161_s26  ;;  %s2195_s28 = spop %2194 }
 0x64c   :  { %s1712_s9 = sadd.f32 %s3159_s25, %s3155_s24  ;;  %s1690_s3 = smul.f32 129.0, %s1689_s27 }
 0x64d   :  { %p1708_p2 = scmp.gt.f32.partialorder %s3161_s26, 0.0 }
 0x64e   :  { %v1691_v32 = vstv %s1690_s3 }
 0x64f   :  { %2245 = vrcp.f32 %v1691_v32 }
 0x659   :  { %v2246_v33 = vpop.eup %2245 }
 0x65a   :  { %2196 = vpush %v2246_v33 }
 0x65b   :  { %2198 = vpush %v1703_v13 }
 0x65c   :  { %2200 = vpush %v1733_v36 }
 0x65d   :  { %2202 = vpush %v1775_v40 }
 0x65e   :  { %2204 = vpush %v1813_v20 }
 0x65f   :  { %2206 = vpush %v1851_v37 }
 0x68b   :  { %s2197_s5 = spop %2196 }
 0x68c   :  { %s1694_s29 = smul.f32 %s2197_s5, %s2195_s28  ;;  %s2199_s15 = spop %2198 }
 0x68d   :  { %s1707_s17 = smul.f32 0.00096899224, %s2199_s15  ;;  %s2201_s18 = spop %2200 }
 0x68e   :  { %s1737_s19 = smul.f32 0.125, %s2201_s18  ;;  %s2203_s20 = spop %2202 }
 0x68f   :  { %s3209_s29 = smov (!%p1708_p2, %s1694_s29), %s1707_s17  ;;  %s2205_s2 = spop %2204 }
 0x690   :  { %s1713_s30 = sadd.f32 %s1712_s9, %s3209_s29  ;;  %s1738_s21 = smul.f32 100.0, %s1737_s19  ;;  %v1864_v26 = vstv %s3209_s29 }
 0x691   :  { %s2207_s22 = spop %2206  ;;  %s1779_s10 = smul.f32 0.015625, %s2203_s20 }
 0x692   :  { %v1856_v39 = vstv %s1713_s30  ;;  %s1817_s4 = smul.f32 0.015625, %s2205_s2  ;;  %v1867_v35 = vstv %s1738_s21 }
 0x693   :  { %v1859_v15 = vsel %vm1857_vm4, %v1858_v38, %v1856_v39  ;;  %s1855_s0 = smul.f32 0.015625, %s2207_s22  ;;  %v1870_v45 = vstv %s1779_s10 }
 0x694   :  { %v1862_v42 = vsel %vm1860_vm5, %v1861_v2, %v1859_v15  ;;  %v1873_v46 = vstv %s1817_s4 }
 0x695   :  { %v1865_v16 = vsel %vm1863_vm7, %v1864_v26, %v1862_v42  ;;  %v1876_v59 = vstv %s1855_s0 }
 0x696   :  { %v1868_v18 = vsel %vm1866_vm2, %v1867_v35, %v1865_v16 }
 0x697   :  { %v1871_v3 = vsel %vm1869_vm8, %v1870_v45, %v1868_v18 }
 0x698   :  { %v1874_v47 = vsel %vm1872_vm1, %v1873_v46, %v1871_v3 }
 0x699   :  { %v1877_v1 = vsel %vm1875_vm11, %v1876_v59, %v1874_v47 }
 0x69a   :  { %1879 = vst.msk [vmem:[#allocation7] sm:$0x1] %vm1878_vm10, %v1877_v1 }
 0x69b   :  { %2302 = shalt.err (!%p2299_p7)
}
 0x69c   :  { %s2303_s23 = scalar_lea.hbm %s3207_s14, 16 }
 0x69d   :  { %p2304_p8 = scmp.ne.s32.totalorder %s3207_s14, %s2303_s23  ;;  %p2307_p9 = scmp.lt.u32.totalorder %s2303_s23, %s3207_s14 }
 0x69f   :  { %p2309_p10 = pnand %p2307_p9, %p2304_p8 }
 0x6a1   :  { %2312 = shalt.err (!%p2309_p10)
}
 0x6a2   :  { %1889 = dma.vmem_to_hbm [thread:$0]  %s1887_s8, 16, %s3207_s14, [#allocation4]  }
 0x6a3   :  { %2317 = dma.done.wait [#allocation4], 16  }
 0x6a4   :  { %2318 = vsyncadd [#allocation4], 4294967280 }
 0x6a5   :  { %1893 = vsyncpa [#allocation3], 1 }
 0x6a6   :  { %1894 = vsyncpa [#allocation6], 1 }
 0x6a7   :  { %1895 = vsyncpa [#allocation4], 1 }

</bundles_post_ra>
